<compile_context>
chip_gen: v7x
topology: tpu7x:2x2x1
jax: 0.10.0
libtpu: 0.0.40
codegen_flags: <defaults>
</compile_context>

<pallas_src>
import math

import jax
import jax.numpy as jnp
from jax import lax
from jax.experimental import pallas as pl
from jax.experimental.pallas import tpu as pltpu

_LN_EPS = 1e-5  # PyTorch nn.LayerNorm default


def _make_block_kernel(n_heads: int, head_size: int, matmul_dtype):
    C = n_heads * head_size

    def block_kernel(x_ref, ln1w_ref, ln1b_ref, wqkv_ref, wprojr_ref,
                     ln2w_ref, ln2b_ref, ww_ref, wv_ref, ww2_ref, o_ref):
        x = x_ref[0]                                            # (T, C), f32
        T = x.shape[0]

        # ---- LayerNorm 1 (f32 VPU math) ----
        mu = jnp.mean(x, axis=-1, keepdims=True)
        xc = x - mu
        var = jnp.mean(xc * xc, axis=-1, keepdims=True)
        x1 = xc * lax.rsqrt(var + _LN_EPS) * ln1w_ref[...] + ln1b_ref[...]

        # ---- Fused QKV for ALL heads, one MXU pass (1/sqrt(hs) folded into Q cols) ----
        # MXU accumulates in f32; result written directly in matmul_dtype (single cast).
        qkv = jnp.dot(x1.astype(matmul_dtype), wqkv_ref[...],
                      preferred_element_type=matmul_dtype)      # (T, 3C)

        # Causal additive bias, built once per kernel invocation (hoisted out of head loop).
        row = lax.broadcasted_iota(jnp.int32, (T, T), 0)
        col = lax.broadcasted_iota(jnp.int32, (T, T), 1)
        mask_bias = jnp.where(col <= row, 0.0, -1e30).astype(jnp.float32)

        # ---- Attention: output projection folded into the per-head loop, so every
        # accumulation target is a lane-dense (T, C) f32 tile (no concatenate, no narrow
        # per-head stores, no head outputs kept live).
        attn = jnp.zeros((T, C), jnp.float32)
        for h in range(n_heads):
            lo = h * head_size
            qh = qkv[:, lo:lo + head_size]
            kh = qkv[:, C + lo:C + lo + head_size]
            vh = qkv[:, 2 * C + lo:2 * C + lo + head_size]

            # q @ k^T without an in-kernel transpose (contract dim 1 of both operands).
            s = lax.dot_general(qh, kh, (((1,), (1,)), ((), ())),
                                preferred_element_type=jnp.float32) + mask_bias

            # Numerically-stable softmax in f32; EUP exp + approx reciprocal.
            m = jnp.max(s, axis=-1, keepdims=True)
            p = jnp.exp(s - m)
            p = p * pl.reciprocal(jnp.sum(p, axis=-1, keepdims=True), approx=True)
            # TODO(synk): attention dropout (training=True) not implemented; eval path only.

            oh = jnp.dot(p.astype(matmul_dtype), vh,
                         preferred_element_type=matmul_dtype)   # (T, hs)
            # Per-head slice of the output projection, accumulated lane-dense in f32.
            attn = attn + jnp.dot(oh, wprojr_ref[h],
                                  preferred_element_type=jnp.float32)  # (T, C)

        # TODO(synk): MHA output dropout / SwiGLU dropout not implemented (eval path).
        x2 = x1 + attn                                          # residual off post-LN1 x

        # ---- LayerNorm 2 ----
        mu2 = jnp.mean(x2, axis=-1, keepdims=True)
        xc2 = x2 - mu2
        var2 = jnp.mean(xc2 * xc2, axis=-1, keepdims=True)
        x3 = xc2 * lax.rsqrt(var2 + _LN_EPS) * ln2w_ref[...] + ln2b_ref[...]

        # ---- SwiGLU feed-forward (hidden dim zero-padded to a lane-dense multiple of 128)
        x3m = x3.astype(matmul_dtype)
        g = jnp.dot(x3m, ww_ref[...], preferred_element_type=jnp.float32)   # (T, Hp)
        u = jnp.dot(x3m, wv_ref[...], preferred_element_type=jnp.float32)   # (T, Hp)
        silu = g * pl.reciprocal(1.0 + jnp.exp(-g), approx=True)            # x * sigmoid(x)
        ff = jnp.dot((silu * u).astype(matmul_dtype), ww2_ref[...],
                     preferred_element_type=jnp.float32)                     # (T, C)

        o_ref[0] = (x3 + ff).astype(o_ref.dtype)

    return block_kernel


def prepare_block_params(params, n_heads: int, matmul_dtype=jnp.bfloat16):
    """One-time layout plumbing (do NOT call per forward step): transposes, per-head
    stacking, QKV fusion, scale folding, lane padding and matmul-dtype casting."""
    C = params["proj_w"].shape[0]
    hs = C // n_heads
    scale = 1.0 / math.sqrt(hs)

    qkv_w = params["qkv_w"]                       # (n_heads, 3*hs, C), torch (out, in)

    def stack_heads(comp):                        # comp 0: q, 1: k, 2: v -> (C, n_heads*hs)
        w = qkv_w[:, comp * hs:(comp + 1) * hs, :]           # (H, hs, C)
        return jnp.transpose(w, (2, 0, 1)).reshape(C, n_heads * hs)

    wqkv = jnp.concatenate([stack_heads(0) * scale,          # fold 1/sqrt(hs) into Q cols
                            stack_heads(1), stack_heads(2)], axis=1)        # (C, 3C)
    wprojr = params["proj_w"].T.reshape(n_heads, hs, C)      # per-head rows of proj^T

    ww = params["w_w"].T                          # (C, Hff)
    wv = params["w_v"].T                          # (C, Hff)
    ww2 = params["w_w2"].T                        # (Hff, C)
    Hff = ww.shape[1]
    Hp = ((Hff + 127) // 128) * 128               # zero-pad hidden dim -> lane-dense
    if Hp != Hff:
        ww = jnp.pad(ww, ((0, 0), (0, Hp - Hff)))
        wv = jnp.pad(wv, ((0, 0), (0, Hp - Hff)))
        ww2 = jnp.pad(ww2, ((0, Hp - Hff), (0, 0)))

    return {
        "wqkv": wqkv.astype(matmul_dtype),
        "wprojr": wprojr.astype(matmul_dtype),
        "ww": ww.astype(matmul_dtype),
        "wv": wv.astype(matmul_dtype),
        "ww2": ww2.astype(matmul_dtype),
        # LayerNorm params stay f32 (f32 VPU math); (1, C) so kernel broadcast is 2-D.
        "ln1_w": params["ln1_w"].reshape(1, C).astype(jnp.float32),
        "ln1_b": params["ln1_b"].reshape(1, C).astype(jnp.float32),
        "ln2_w": params["ln2_w"].reshape(1, C).astype(jnp.float32),
        "ln2_b": params["ln2_b"].reshape(1, C).astype(jnp.float32),
    }


def block_forward(x, prepared, n_heads: int):
    """x: (B, T, C) f32. `prepared` comes from prepare_block_params (called once)."""
    B, T, C = x.shape
    head_size = C // n_heads
    matmul_dtype = prepared["wqkv"].dtype

    ln1w, ln1b = prepared["ln1_w"], prepared["ln1_b"]
    ln2w, ln2b = prepared["ln2_w"], prepared["ln2_b"]
    wqkv, wprojr = prepared["wqkv"], prepared["wprojr"]
    ww, wv, ww2 = prepared["ww"], prepared["wv"], prepared["ww2"]
    Hp = ww.shape[1]

    kernel = _make_block_kernel(n_heads, head_size, matmul_dtype)

    weight_args = (ln1w, ln1b, wqkv, wprojr, ln2w, ln2b, ww, wv, ww2)
    weight_bytes = sum(int(a.size) * a.dtype.itemsize for a in weight_args)
    act_bytes = T * C * x.dtype.itemsize                      # one (1, T, C) block
    interm_bytes = T * (3 * C + n_heads * T + 2 * Hp) * 4     # qkv / scores / FFN estimate
    vmem_limit = int(min(64 * 1024 * 1024,
                         max(16 * 1024 * 1024,
                             2 * weight_bytes + 4 * act_bytes + 2 * interm_bytes
                             + (4 << 20))))

    def build(single_buffer_weights: bool):
        def wspec(shape):
            n = len(shape)
            idx = lambda b: (0,) * n          # grid-invariant weight block
            if single_buffer_weights:
                return pl.BlockSpec(shape, idx, pipeline_mode=pl.Buffered(1))
            return pl.BlockSpec(shape, idx)

        in_specs = [
            pl.BlockSpec((1, T, C), lambda b: (b, 0, 0)),     # x (pipelined over B)
            wspec((1, C)), wspec((1, C)),                     # ln1 w / b
            wspec((C, 3 * C)),                                # fused, scale-folded QKV
            wspec((n_heads, head_size, C)),                   # per-head proj^T rows
            wspec((1, C)), wspec((1, C)),                     # ln2 w / b
            wspec((C, Hp)), wspec((C, Hp)), wspec((Hp, C)),   # SwiGLU (lane-padded)
        ]
        return pl.pallas_call(
            kernel,
            out_shape=jax.ShapeDtypeStruct((B, T, C), x.dtype),
            grid_spec=pltpu.PrefetchScalarGridSpec(
                num_scalar_prefetch=0,
                grid=(B,),
                in_specs=in_specs,
                out_specs=pl.BlockSpec((1, T, C), lambda b: (b, 0, 0)),
            ),
            compiler_params=pltpu.CompilerParams(
                dimension_semantics=("parallel",),            # B>=2 keeps both v7x TCs busy
                vmem_limit_bytes=vmem_limit),
        )

    args = (x, ln1w, ln1b, wqkv, wprojr, ln2w, ln2b, ww, wv, ww2)
    try:
        return build(True)(*args)
    except Exception:
        # TODO(synk): pl.Buffered(1) (single-buffered grid-invariant weights) rejected on
        # this jax version; fall back to default double-buffering.
        return build(False)(*args)


# ---------------- pure-JAX reference (for a correctness sanity check) ----------------
def block_reference(x, params, n_heads: int):
    C = x.shape[-1]
    hs = C // n_heads
    T = x.shape[1]

    def layernorm(y, w, b):
        mu = jnp.mean(y, -1, keepdims=True)
        var = jnp.mean((y - mu) ** 2, -1, keepdims=True)
        return (y - mu) / jnp.sqrt(var + _LN_EPS) * w + b

    x1 = layernorm(x, params["ln1_w"], params["ln1_b"])
    heads = []
    mask = jnp.tril(jnp.ones((T, T), bool))
    for h in range(n_heads):
        w = params["qkv_w"][h]                       # (3*hs, C)
        qkv = x1 @ w.T                               # (B, T, 3*hs)
        q, k, v = qkv[..., :hs], qkv[..., hs:2 * hs], qkv[..., 2 * hs:]
        s = jnp.einsum("btd,bsd->bts", q, k) / math.sqrt(hs)
        s = jnp.where(mask, s, -jnp.inf)
        p = jax.nn.softmax(s, axis=-1)
        heads.append(jnp.einsum("bts,bsd->btd", p, v))
    attn = jnp.concatenate(heads, -1) @ params["proj_w"].T
    x2 = x1 + attn
    x3 = layernorm(x2, params["ln2_w"], params["ln2_b"])
    g = x3 @ params["w_w"].T
    u = x3 @ params["w_v"].T
    ff = (jax.nn.silu(g) * u) @ params["w_w2"].T
    return x3 + ff


def xavier_uniform(key, shape):
    fan_out, fan_in = shape
    bound = math.sqrt(6.0 / (fan_in + fan_out))
    return jax.random.uniform(key, shape, dtype=jnp.float32, minval=-bound, maxval=bound)


if __name__ == "__main__":
    B, T = 2, 8
    n_embed = 32
    n_heads = 2
    head_size = n_embed // n_heads
    hidden_size = int(n_embed * (4 * (2 / 3)))       # SwiGLU hidden (= 85 for n_embed=32)

    key = jax.random.PRNGKey(0)
    kx, kq, kp, kw1, kw2, kw3 = jax.random.split(key, 6)
    x = jax.random.normal(kx, (B, T, n_embed), dtype=jnp.float32)

    params = {
        # per-head fused qkv weight, torch nn.Linear layout (out=3*hs, in=C)
        "qkv_w": xavier_uniform(kq, (n_heads * 3 * head_size, n_embed)
                                ).reshape(n_heads, 3 * head_size, n_embed),
        # output projection, default nn.Linear init
        "proj_w": jax.random.uniform(kp, (n_embed, n_embed), dtype=jnp.float32,
                                     minval=-1.0 / math.sqrt(n_embed),
                                     maxval=1.0 / math.sqrt(n_embed)),
        # SwiGLU weights (xavier as in the module)
        "w_w": xavier_uniform(kw1, (hidden_size, n_embed)),
        "w_v": xavier_uniform(kw2, (hidden_size, n_embed)),
        "w_w2": xavier_uniform(kw3, (n_embed, hidden_size)),
        # LayerNorm params (torch init: ones / zeros)
        "ln1_w": jnp.ones((n_embed,), jnp.float32),
        "ln1_b": jnp.zeros((n_embed,), jnp.float32),
        "ln2_w": jnp.ones((n_embed,), jnp.float32),
        "ln2_b": jnp.zeros((n_embed,), jnp.float32),
    }

    ref = block_reference(x, params, n_heads)

    # f32 MXU path: tight correctness check vs the pure-JAX reference.
    prep_f32 = prepare_block_params(params, n_heads, matmul_dtype=jnp.float32)
    out_f32 = block_forward(x, prep_f32, n_heads)
    jax.block_until_ready(out_f32)
    assert out_f32.shape == (B, T, n_embed)
    assert jnp.allclose(out_f32, ref, rtol=1e-2, atol=1e-2), "f32 kernel mismatch vs reference"

    # bf16 MXU path (default / performance configuration).
    prep_bf16 = prepare_block_params(params, n_heads)        # matmul_dtype=bfloat16
    out = block_forward(x, prep_bf16, n_heads)
    jax.block_until_ready(out)
    assert out.shape == (B, T, n_embed)
    assert jnp.allclose(out, ref, rtol=5e-2, atol=5e-2), "bf16 kernel mismatch vs reference"

    print("KERNEL_OK")
</pallas_src>

<mosaic_0001>
module attributes {stable_mosaic.version = 11 : i64} {
  func.func @block_kernel(%arg0: i32, %arg1: memref<1x8x32xf32, #tpu.memory_space<vmem>>, %arg2: memref<1x32xf32, #tpu.memory_space<vmem>>, %arg3: memref<1x32xf32, #tpu.memory_space<vmem>>, %arg4: memref<32x96xf32, #tpu.memory_space<vmem>>, %arg5: memref<2x16x32xf32, #tpu.memory_space<vmem>>, %arg6: memref<1x32xf32, #tpu.memory_space<vmem>>, %arg7: memref<1x32xf32, #tpu.memory_space<vmem>>, %arg8: memref<32x128xf32, #tpu.memory_space<vmem>>, %arg9: memref<32x128xf32, #tpu.memory_space<vmem>>, %arg10: memref<128x32xf32, #tpu.memory_space<vmem>>, %arg11: memref<1x8x32xf32, #tpu.memory_space<vmem>>) attributes {dimension_semantics = [#tpu.dimension_semantics<parallel>], iteration_bounds = array<i64: 2>, scalar_prefetch = 0 : i64, scratch_operands = 0 : i64, tpu.core_type = #tpu.core_type<tc>, window_params = [{transform_indices = @transform_0, window_bounds = array<i64: 1, 8, 32>}, {pipeline_mode = #tpu.pipeline_mode<synchronous>, transform_indices = @transform_1, window_bounds = array<i64: 1, 32>}, {pipeline_mode = #tpu.pipeline_mode<synchronous>, transform_indices = @transform_2, window_bounds = array<i64: 1, 32>}, {pipeline_mode = #tpu.pipeline_mode<synchronous>, transform_indices = @transform_3, window_bounds = array<i64: 32, 96>}, {pipeline_mode = #tpu.pipeline_mode<synchronous>, transform_indices = @transform_4, window_bounds = array<i64: 2, 16, 32>}, {pipeline_mode = #tpu.pipeline_mode<synchronous>, transform_indices = @transform_5, window_bounds = array<i64: 1, 32>}, {pipeline_mode = #tpu.pipeline_mode<synchronous>, transform_indices = @transform_6, window_bounds = array<i64: 1, 32>}, {pipeline_mode = #tpu.pipeline_mode<synchronous>, transform_indices = @transform_7, window_bounds = array<i64: 32, 128>}, {pipeline_mode = #tpu.pipeline_mode<synchronous>, transform_indices = @transform_8, window_bounds = array<i64: 32, 128>}, {pipeline_mode = #tpu.pipeline_mode<synchronous>, transform_indices = @transform_9, window_bounds = array<i64: 128, 32>}, {transform_indices = @transform_10, window_bounds = array<i64: 1, 8, 32>}]} {
    %c0 = arith.constant 0 : index
    %c0_0 = arith.constant 0 : index
    %c0_1 = arith.constant 0 : index
    %0 = vector.load %arg1[%c0, %c0_0, %c0_1] : memref<1x8x32xf32, #tpu.memory_space<vmem>>, vector<1x8x32xf32>
    %1 = vector.shape_cast %0 : vector<1x8x32xf32> to vector<8x32xf32>
    %cst = arith.constant dense<0.000000e+00> : vector<8xf32>
    %2 = vector.multi_reduction <add>, %1, %cst [1] : vector<8x32xf32> to vector<8xf32>
    %3 = vector.shape_cast %2 : vector<8xf32> to vector<8x1xf32>
    %cst_2 = arith.constant 3.200000e+01 : f32
    %4 = vector.broadcast %cst_2 : f32 to vector<8x1xf32>
    %5 = arith.divf %3, %4 : vector<8x1xf32>
    %6 = vector.broadcast %5 : vector<8x1xf32> to vector<8x32xf32>
    %7 = arith.subf %1, %6 : vector<8x32xf32>
    %8 = arith.mulf %7, %7 : vector<8x32xf32>
    %cst_3 = arith.constant dense<0.000000e+00> : vector<8xf32>
    %9 = vector.multi_reduction <add>, %8, %cst_3 [1] : vector<8x32xf32> to vector<8xf32>
    %10 = vector.shape_cast %9 : vector<8xf32> to vector<8x1xf32>
    %cst_4 = arith.constant 3.200000e+01 : f32
    %11 = vector.broadcast %cst_4 : f32 to vector<8x1xf32>
    %12 = arith.divf %10, %11 : vector<8x1xf32>
    %cst_5 = arith.constant 9.99999974E-6 : f32
    %13 = vector.broadcast %cst_5 : f32 to vector<8x1xf32>
    %14 = arith.addf %12, %13 : vector<8x1xf32>
    %15 = math.rsqrt %14 : vector<8x1xf32>
    %16 = vector.broadcast %15 : vector<8x1xf32> to vector<8x32xf32>
    %17 = arith.mulf %7, %16 : vector<8x32xf32>
    %c0_6 = arith.constant 0 : index
    %c0_7 = arith.constant 0 : index
    %18 = vector.load %arg2[%c0_6, %c0_7] : memref<1x32xf32, #tpu.memory_space<vmem>>, vector<1x32xf32>
    %19 = vector.broadcast %18 : vector<1x32xf32> to vector<8x32xf32>
    %20 = arith.mulf %17, %19 : vector<8x32xf32>
    %c0_8 = arith.constant 0 : index
    %c0_9 = arith.constant 0 : index
    %21 = vector.load %arg3[%c0_8, %c0_9] : memref<1x32xf32, #tpu.memory_space<vmem>>, vector<1x32xf32>
    %22 = vector.broadcast %21 : vector<1x32xf32> to vector<8x32xf32>
    %23 = arith.addf %20, %22 : vector<8x32xf32>
    %c0_10 = arith.constant 0 : index
    %c0_11 = arith.constant 0 : index
    %24 = vector.load %arg4[%c0_10, %c0_11] : memref<32x96xf32, #tpu.memory_space<vmem>>, vector<32x96xf32>
    %cst_12 = arith.constant dense<0.000000e+00> : vector<8x96xf32>
    %25 = tpu.matmul %23, %24, %cst_12 {dimension_numbers = #tpu.dot_dimension_numbers<[1], [0], [0], [1], [0, 0, 1, 1], [], []>} : vector<8x32xf32>, vector<32x96xf32>, vector<8x96xf32> -> vector<8x96xf32>
    %26 = tpu.iota {dimensions = array<i32: 0>} : vector<8x8xi32>
    %27 = tpu.iota {dimensions = array<i32: 1>} : vector<8x8xi32>
    %28 = arith.cmpi sle, %27, %26 : vector<8x8xi32>
    %cst_13 = arith.constant 0.000000e+00 : f32
    %cst_14 = arith.constant -1.000000e+30 : f32
    %29 = vector.broadcast %cst_13 : f32 to vector<8x8xf32>
    %30 = vector.broadcast %cst_14 : f32 to vector<8x8xf32>
    %31 = arith.select %28, %29, %30 : vector<8x8xi1>, vector<8x8xf32>
    %cst_15 = arith.constant 0.000000e+00 : f32
    %32 = vector.broadcast %cst_15 : f32 to vector<8x32xf32>
    %33 = vector.extract_strided_slice %25 {offsets = [0, 0], sizes = [8, 16], strides = [1, 1]} : vector<8x96xf32> to vector<8x16xf32>
    %34 = vector.extract_strided_slice %25 {offsets = [0, 32], sizes = [8, 16], strides = [1, 1]} : vector<8x96xf32> to vector<8x16xf32>
    %35 = vector.extract_strided_slice %25 {offsets = [0, 64], sizes = [8, 16], strides = [1, 1]} : vector<8x96xf32> to vector<8x16xf32>
    %cst_16 = arith.constant dense<0.000000e+00> : vector<8x8xf32>
    %36 = tpu.matmul %33, %34, %cst_16 {dimension_numbers = #tpu.dot_dimension_numbers<[1], [1], [0], [0], [0, 0, 1, 0], [], []>} : vector<8x16xf32>, vector<8x16xf32>, vector<8x8xf32> -> vector<8x8xf32>
    %37 = arith.addf %36, %31 : vector<8x8xf32>
    %cst_17 = arith.constant dense<0xFF800000> : vector<8xf32>
    %38 = vector.multi_reduction <maximumf>, %37, %cst_17 [1] : vector<8x8xf32> to vector<8xf32>
    %39 = vector.shape_cast %38 : vector<8xf32> to vector<8x1xf32>
    %40 = vector.broadcast %39 : vector<8x1xf32> to vector<8x8xf32>
    %41 = arith.subf %37, %40 : vector<8x8xf32>
    %42 = math.exp %41 : vector<8x8xf32>
    %cst_18 = arith.constant dense<0.000000e+00> : vector<8xf32>
    %43 = vector.multi_reduction <add>, %42, %cst_18 [1] : vector<8x8xf32> to vector<8xf32>
    %44 = vector.shape_cast %43 : vector<8xf32> to vector<8x1xf32>
    %45 = tpu.reciprocal %44 {approx = true} : vector<8x1xf32> -> vector<8x1xf32>
    %46 = vector.broadcast %45 : vector<8x1xf32> to vector<8x8xf32>
    %47 = arith.mulf %42, %46 : vector<8x8xf32>
    %cst_19 = arith.constant dense<0.000000e+00> : vector<8x16xf32>
    %48 = tpu.matmul %47, %35, %cst_19 {dimension_numbers = #tpu.dot_dimension_numbers<[1], [0], [0], [1], [0, 0, 1, 1], [], []>} : vector<8x8xf32>, vector<8x16xf32>, vector<8x16xf32> -> vector<8x16xf32>
    %c0_20 = arith.constant 0 : index
    %c0_21 = arith.constant 0 : index
    %c0_22 = arith.constant 0 : index
    %49 = vector.load %arg5[%c0_20, %c0_21, %c0_22] : memref<2x16x32xf32, #tpu.memory_space<vmem>>, vector<1x16x32xf32>
    %50 = vector.shape_cast %49 : vector<1x16x32xf32> to vector<16x32xf32>
    %cst_23 = arith.constant dense<0.000000e+00> : vector<8x32xf32>
    %51 = tpu.matmul %48, %50, %cst_23 {dimension_numbers = #tpu.dot_dimension_numbers<[1], [0], [0], [1], [0, 0, 1, 1], [], []>} : vector<8x16xf32>, vector<16x32xf32>, vector<8x32xf32> -> vector<8x32xf32>
    %52 = arith.addf %32, %51 : vector<8x32xf32>
    %53 = vector.extract_strided_slice %25 {offsets = [0, 16], sizes = [8, 16], strides = [1, 1]} : vector<8x96xf32> to vector<8x16xf32>
    %54 = vector.extract_strided_slice %25 {offsets = [0, 48], sizes = [8, 16], strides = [1, 1]} : vector<8x96xf32> to vector<8x16xf32>
    %55 = vector.extract_strided_slice %25 {offsets = [0, 80], sizes = [8, 16], strides = [1, 1]} : vector<8x96xf32> to vector<8x16xf32>
    %cst_24 = arith.constant dense<0.000000e+00> : vector<8x8xf32>
    %56 = tpu.matmul %53, %54, %cst_24 {dimension_numbers = #tpu.dot_dimension_numbers<[1], [1], [0], [0], [0, 0, 1, 0], [], []>} : vector<8x16xf32>, vector<8x16xf32>, vector<8x8xf32> -> vector<8x8xf32>
    %57 = arith.addf %56, %31 : vector<8x8xf32>
    %cst_25 = arith.constant dense<0xFF800000> : vector<8xf32>
    %58 = vector.multi_reduction <maximumf>, %57, %cst_25 [1] : vector<8x8xf32> to vector<8xf32>
    %59 = vector.shape_cast %58 : vector<8xf32> to vector<8x1xf32>
    %60 = vector.broadcast %59 : vector<8x1xf32> to vector<8x8xf32>
    %61 = arith.subf %57, %60 : vector<8x8xf32>
    %62 = math.exp %61 : vector<8x8xf32>
    %cst_26 = arith.constant dense<0.000000e+00> : vector<8xf32>
    %63 = vector.multi_reduction <add>, %62, %cst_26 [1] : vector<8x8xf32> to vector<8xf32>
    %64 = vector.shape_cast %63 : vector<8xf32> to vector<8x1xf32>
    %65 = tpu.reciprocal %64 {approx = true} : vector<8x1xf32> -> vector<8x1xf32>
    %66 = vector.broadcast %65 : vector<8x1xf32> to vector<8x8xf32>
    %67 = arith.mulf %62, %66 : vector<8x8xf32>
    %cst_27 = arith.constant dense<0.000000e+00> : vector<8x16xf32>
    %68 = tpu.matmul %67, %55, %cst_27 {dimension_numbers = #tpu.dot_dimension_numbers<[1], [0], [0], [1], [0, 0, 1, 1], [], []>} : vector<8x8xf32>, vector<8x16xf32>, vector<8x16xf32> -> vector<8x16xf32>
    %c1 = arith.constant 1 : index
    %c0_28 = arith.constant 0 : index
    %c0_29 = arith.constant 0 : index
    %69 = vector.load %arg5[%c1, %c0_28, %c0_29] : memref<2x16x32xf32, #tpu.memory_space<vmem>>, vector<1x16x32xf32>
    %70 = vector.shape_cast %69 : vector<1x16x32xf32> to vector<16x32xf32>
    %cst_30 = arith.constant dense<0.000000e+00> : vector<8x32xf32>
    %71 = tpu.matmul %68, %70, %cst_30 {dimension_numbers = #tpu.dot_dimension_numbers<[1], [0], [0], [1], [0, 0, 1, 1], [], []>} : vector<8x16xf32>, vector<16x32xf32>, vector<8x32xf32> -> vector<8x32xf32>
    %72 = arith.addf %52, %71 : vector<8x32xf32>
    %73 = arith.addf %23, %72 : vector<8x32xf32>
    %cst_31 = arith.constant dense<0.000000e+00> : vector<8xf32>
    %74 = vector.multi_reduction <add>, %73, %cst_31 [1] : vector<8x32xf32> to vector<8xf32>
    %75 = vector.shape_cast %74 : vector<8xf32> to vector<8x1xf32>
    %cst_32 = arith.constant 3.200000e+01 : f32
    %76 = vector.broadcast %cst_32 : f32 to vector<8x1xf32>
    %77 = arith.divf %75, %76 : vector<8x1xf32>
    %78 = vector.broadcast %77 : vector<8x1xf32> to vector<8x32xf32>
    %79 = arith.subf %73, %78 : vector<8x32xf32>
    %80 = arith.mulf %79, %79 : vector<8x32xf32>
    %cst_33 = arith.constant dense<0.000000e+00> : vector<8xf32>
    %81 = vector.multi_reduction <add>, %80, %cst_33 [1] : vector<8x32xf32> to vector<8xf32>
    %82 = vector.shape_cast %81 : vector<8xf32> to vector<8x1xf32>
    %cst_34 = arith.constant 3.200000e+01 : f32
    %83 = vector.broadcast %cst_34 : f32 to vector<8x1xf32>
    %84 = arith.divf %82, %83 : vector<8x1xf32>
    %cst_35 = arith.constant 9.99999974E-6 : f32
    %85 = vector.broadcast %cst_35 : f32 to vector<8x1xf32>
    %86 = arith.addf %84, %85 : vector<8x1xf32>
    %87 = math.rsqrt %86 : vector<8x1xf32>
    %88 = vector.broadcast %87 : vector<8x1xf32> to vector<8x32xf32>
    %89 = arith.mulf %79, %88 : vector<8x32xf32>
    %c0_36 = arith.constant 0 : index
    %c0_37 = arith.constant 0 : index
    %90 = vector.load %arg6[%c0_36, %c0_37] : memref<1x32xf32, #tpu.memory_space<vmem>>, vector<1x32xf32>
    %91 = vector.broadcast %90 : vector<1x32xf32> to vector<8x32xf32>
    %92 = arith.mulf %89, %91 : vector<8x32xf32>
    %c0_38 = arith.constant 0 : index
    %c0_39 = arith.constant 0 : index
    %93 = vector.load %arg7[%c0_38, %c0_39] : memref<1x32xf32, #tpu.memory_space<vmem>>, vector<1x32xf32>
    %94 = vector.broadcast %93 : vector<1x32xf32> to vector<8x32xf32>
    %95 = arith.addf %92, %94 : vector<8x32xf32>
    %c0_40 = arith.constant 0 : index
    %c0_41 = arith.constant 0 : index
    %96 = vector.load %arg8[%c0_40, %c0_41] : memref<32x128xf32, #tpu.memory_space<vmem>>, vector<32x128xf32>
    %cst_42 = arith.constant dense<0.000000e+00> : vector<8x128xf32>
    %97 = tpu.matmul %95, %96, %cst_42 {dimension_numbers = #tpu.dot_dimension_numbers<[1], [0], [0], [1], [0, 0, 1, 1], [], []>} : vector<8x32xf32>, vector<32x128xf32>, vector<8x128xf32> -> vector<8x128xf32>
    %c0_43 = arith.constant 0 : index
    %c0_44 = arith.constant 0 : index
    %98 = vector.load %arg9[%c0_43, %c0_44] : memref<32x128xf32, #tpu.memory_space<vmem>>, vector<32x128xf32>
    %cst_45 = arith.constant dense<0.000000e+00> : vector<8x128xf32>
    %99 = tpu.matmul %95, %98, %cst_45 {dimension_numbers = #tpu.dot_dimension_numbers<[1], [0], [0], [1], [0, 0, 1, 1], [], []>} : vector<8x32xf32>, vector<32x128xf32>, vector<8x128xf32> -> vector<8x128xf32>
    %cst_46 = arith.constant 0.000000e+00 : f32
    %100 = vector.broadcast %cst_46 : f32 to vector<8x128xf32>
    %101 = arith.subf %100, %97 : vector<8x128xf32>
    %102 = math.exp %101 : vector<8x128xf32>
    %cst_47 = arith.constant 1.000000e+00 : f32
    %103 = vector.broadcast %cst_47 : f32 to vector<8x128xf32>
    %104 = arith.addf %103, %102 : vector<8x128xf32>
    %105 = tpu.reciprocal %104 {approx = true} : vector<8x128xf32> -> vector<8x128xf32>
    %106 = arith.mulf %97, %105 : vector<8x128xf32>
    %107 = arith.mulf %106, %99 : vector<8x128xf32>
    %c0_48 = arith.constant 0 : index
    %c0_49 = arith.constant 0 : index
    %108 = vector.load %arg10[%c0_48, %c0_49] : memref<128x32xf32, #tpu.memory_space<vmem>>, vector<128x32xf32>
    %cst_50 = arith.constant dense<0.000000e+00> : vector<8x32xf32>
    %109 = tpu.matmul %107, %108, %cst_50 {dimension_numbers = #tpu.dot_dimension_numbers<[1], [0], [0], [1], [0, 0, 1, 1], [], []>} : vector<8x128xf32>, vector<128x32xf32>, vector<8x32xf32> -> vector<8x32xf32>
    %110 = arith.addf %95, %109 : vector<8x32xf32>
    %c0_51 = arith.constant 0 : index
    %c0_52 = arith.constant 0 : index
    %c0_53 = arith.constant 0 : index
    %111 = vector.load %arg11[%c0_51, %c0_52, %c0_53] : memref<1x8x32xf32, #tpu.memory_space<vmem>>, vector<1x8x32xf32>
    %112 = vector.shape_cast %111 : vector<1x8x32xf32> to vector<8x32xf32>
    %113 = vector.shape_cast %110 : vector<8x32xf32> to vector<1x8x32xf32>
    tpu.vector_store %arg11[%c0_51, %c0_52, %c0_53], %113 {strides = array<i32>} : memref<1x8x32xf32, #tpu.memory_space<vmem>>, vector<1x8x32xf32>,
    return
  }
  func.func @transform_0(%arg0: i32) -> (i32, i32, i32) {
    %c0_i32 = arith.constant 0 : i32
    %c0_i32_0 = arith.constant 0 : i32
    %c0_i32_1 = arith.constant 0 : i32
    return %arg0, %c0_i32, %c0_i32_0 : i32, i32, i32
  }
  func.func @transform_1(%arg0: i32) -> (i32, i32) {
    %c0_i32 = arith.constant 0 : i32
    %c0_i32_0 = arith.constant 0 : i32
    %c0_i32_1 = arith.constant 0 : i32
    return %c0_i32, %c0_i32_0 : i32, i32
  }
  func.func @transform_2(%arg0: i32) -> (i32, i32) {
    %c0_i32 = arith.constant 0 : i32
    %c0_i32_0 = arith.constant 0 : i32
    %c0_i32_1 = arith.constant 0 : i32
    return %c0_i32, %c0_i32_0 : i32, i32
  }
  func.func @transform_3(%arg0: i32) -> (i32, i32) {
    %c0_i32 = arith.constant 0 : i32
    %c0_i32_0 = arith.constant 0 : i32
    %c0_i32_1 = arith.constant 0 : i32
    return %c0_i32, %c0_i32_0 : i32, i32
  }
  func.func @transform_4(%arg0: i32) -> (i32, i32, i32) {
    %c0_i32 = arith.constant 0 : i32
    %c0_i32_0 = arith.constant 0 : i32
    %c0_i32_1 = arith.constant 0 : i32
    %c0_i32_2 = arith.constant 0 : i32
    return %c0_i32, %c0_i32_0, %c0_i32_1 : i32, i32, i32
  }
  func.func @transform_5(%arg0: i32) -> (i32, i32) {
    %c0_i32 = arith.constant 0 : i32
    %c0_i32_0 = arith.constant 0 : i32
    %c0_i32_1 = arith.constant 0 : i32
    return %c0_i32, %c0_i32_0 : i32, i32
  }
  func.func @transform_6(%arg0: i32) -> (i32, i32) {
    %c0_i32 = arith.constant 0 : i32
    %c0_i32_0 = arith.constant 0 : i32
    %c0_i32_1 = arith.constant 0 : i32
    return %c0_i32, %c0_i32_0 : i32, i32
  }
  func.func @transform_7(%arg0: i32) -> (i32, i32) {
    %c0_i32 = arith.constant 0 : i32
    %c0_i32_0 = arith.constant 0 : i32
    %c0_i32_1 = arith.constant 0 : i32
    return %c0_i32, %c0_i32_0 : i32, i32
  }
  func.func @transform_8(%arg0: i32) -> (i32, i32) {
    %c0_i32 = arith.constant 0 : i32
    %c0_i32_0 = arith.constant 0 : i32
    %c0_i32_1 = arith.constant 0 : i32
    return %c0_i32, %c0_i32_0 : i32, i32
  }
  func.func @transform_9(%arg0: i32) -> (i32, i32) {
    %c0_i32 = arith.constant 0 : i32
    %c0_i32_0 = arith.constant 0 : i32
    %c0_i32_1 = arith.constant 0 : i32
    return %c0_i32, %c0_i32_0 : i32, i32
  }
  func.func @transform_10(%arg0: i32) -> (i32, i32, i32) {
    %c0_i32 = arith.constant 0 : i32
    %c0_i32_0 = arith.constant 0 : i32
    %c0_i32_1 = arith.constant 0 : i32
    return %arg0, %c0_i32, %c0_i32_0 : i32, i32, i32
  }
}

module attributes {stable_mosaic.version = 11 : i64} {
  func.func @block_kernel(%arg0: i32, %arg1: memref<1x8x32xf32, #tpu.memory_space<vmem>>, %arg2: memref<1x32xf32, #tpu.memory_space<vmem>>, %arg3: memref<1x32xf32, #tpu.memory_space<vmem>>, %arg4: memref<32x96xf32, #tpu.memory_space<vmem>>, %arg5: memref<2x16x32xf32, #tpu.memory_space<vmem>>, %arg6: memref<1x32xf32, #tpu.memory_space<vmem>>, %arg7: memref<1x32xf32, #tpu.memory_space<vmem>>, %arg8: memref<32x128xf32, #tpu.memory_space<vmem>>, %arg9: memref<32x128xf32, #tpu.memory_space<vmem>>, %arg10: memref<128x32xf32, #tpu.memory_space<vmem>>, %arg11: memref<1x8x32xf32, #tpu.memory_space<vmem>>) attributes {dimension_semantics = [#tpu.dimension_semantics<parallel>], iteration_bounds = array<i64: 2>, scalar_prefetch = 0 : i64, scratch_operands = 0 : i64, tpu.core_type = #tpu.core_type<tc>, window_params = [{transform_indices = @transform_0, window_bounds = array<i64: 1, 8, 32>}, {pipeline_mode = #tpu.pipeline_mode<synchronous>, transform_indices = @transform_1, window_bounds = array<i64: 1, 32>}, {pipeline_mode = #tpu.pipeline_mode<synchronous>, transform_indices = @transform_2, window_bounds = array<i64: 1, 32>}, {pipeline_mode = #tpu.pipeline_mode<synchronous>, transform_indices = @transform_3, window_bounds = array<i64: 32, 96>}, {pipeline_mode = #tpu.pipeline_mode<synchronous>, transform_indices = @transform_4, window_bounds = array<i64: 2, 16, 32>}, {pipeline_mode = #tpu.pipeline_mode<synchronous>, transform_indices = @transform_5, window_bounds = array<i64: 1, 32>}, {pipeline_mode = #tpu.pipeline_mode<synchronous>, transform_indices = @transform_6, window_bounds = array<i64: 1, 32>}, {pipeline_mode = #tpu.pipeline_mode<synchronous>, transform_indices = @transform_7, window_bounds = array<i64: 32, 128>}, {pipeline_mode = #tpu.pipeline_mode<synchronous>, transform_indices = @transform_8, window_bounds = array<i64: 32, 128>}, {pipeline_mode = #tpu.pipeline_mode<synchronous>, transform_indices = @transform_9, window_bounds = array<i64: 128, 32>}, {transform_indices = @transform_10, window_bounds = array<i64: 1, 8, 32>}]} {
    %c0 = arith.constant 0 : index
    %c0_0 = arith.constant 0 : index
    %c0_1 = arith.constant 0 : index
    %0 = vector.load %arg1[%c0, %c0_0, %c0_1] : memref<1x8x32xf32, #tpu.memory_space<vmem>>, vector<1x8x32xf32>
    %1 = vector.shape_cast %0 : vector<1x8x32xf32> to vector<8x32xf32>
    %cst = arith.constant dense<0.000000e+00> : vector<8xf32>
    %2 = vector.multi_reduction <add>, %1, %cst [1] : vector<8x32xf32> to vector<8xf32>
    %3 = vector.shape_cast %2 : vector<8xf32> to vector<8x1xf32>
    %cst_2 = arith.constant 3.200000e+01 : f32
    %4 = vector.broadcast %cst_2 : f32 to vector<8x1xf32>
    %5 = arith.divf %3, %4 : vector<8x1xf32>
    %6 = vector.broadcast %5 : vector<8x1xf32> to vector<8x32xf32>
    %7 = arith.subf %1, %6 : vector<8x32xf32>
    %8 = arith.mulf %7, %7 : vector<8x32xf32>
    %cst_3 = arith.constant dense<0.000000e+00> : vector<8xf32>
    %9 = vector.multi_reduction <add>, %8, %cst_3 [1] : vector<8x32xf32> to vector<8xf32>
    %10 = vector.shape_cast %9 : vector<8xf32> to vector<8x1xf32>
    %cst_4 = arith.constant 3.200000e+01 : f32
    %11 = vector.broadcast %cst_4 : f32 to vector<8x1xf32>
    %12 = arith.divf %10, %11 : vector<8x1xf32>
    %cst_5 = arith.constant 9.99999974E-6 : f32
    %13 = vector.broadcast %cst_5 : f32 to vector<8x1xf32>
    %14 = arith.addf %12, %13 : vector<8x1xf32>
    %15 = math.rsqrt %14 : vector<8x1xf32>
    %16 = vector.broadcast %15 : vector<8x1xf32> to vector<8x32xf32>
    %17 = arith.mulf %7, %16 : vector<8x32xf32>
    %c0_6 = arith.constant 0 : index
    %c0_7 = arith.constant 0 : index
    %18 = vector.load %arg2[%c0_6, %c0_7] : memref<1x32xf32, #tpu.memory_space<vmem>>, vector<1x32xf32>
    %19 = vector.broadcast %18 : vector<1x32xf32> to vector<8x32xf32>
    %20 = arith.mulf %17, %19 : vector<8x32xf32>
    %c0_8 = arith.constant 0 : index
    %c0_9 = arith.constant 0 : index
    %21 = vector.load %arg3[%c0_8, %c0_9] : memref<1x32xf32, #tpu.memory_space<vmem>>, vector<1x32xf32>
    %22 = vector.broadcast %21 : vector<1x32xf32> to vector<8x32xf32>
    %23 = arith.addf %20, %22 : vector<8x32xf32>
    %c0_10 = arith.constant 0 : index
    %c0_11 = arith.constant 0 : index
    %24 = vector.load %arg4[%c0_10, %c0_11] : memref<32x96xf32, #tpu.memory_space<vmem>>, vector<32x96xf32>
    %cst_12 = arith.constant dense<0.000000e+00> : vector<8x96xf32>
    %25 = tpu.matmul %23, %24, %cst_12 {dimension_numbers = #tpu.dot_dimension_numbers<[1], [0], [0], [1], [0, 0, 1, 1], [], []>} : vector<8x32xf32>, vector<32x96xf32>, vector<8x96xf32> -> vector<8x96xf32>
    %26 = tpu.iota {dimensions = array<i32: 0>} : vector<8x8xi32>
    %27 = tpu.iota {dimensions = array<i32: 1>} : vector<8x8xi32>
    %28 = arith.cmpi sle, %27, %26 : vector<8x8xi32>
    %cst_13 = arith.constant 0.000000e+00 : f32
    %cst_14 = arith.constant -1.000000e+30 : f32
    %29 = vector.broadcast %cst_13 : f32 to vector<8x8xf32>
    %30 = vector.broadcast %cst_14 : f32 to vector<8x8xf32>
    %31 = arith.select %28, %29, %30 : vector<8x8xi1>, vector<8x8xf32>
    %cst_15 = arith.constant 0.000000e+00 : f32
    %32 = vector.broadcast %cst_15 : f32 to vector<8x32xf32>
    %33 = vector.extract_strided_slice %25 {offsets = [0, 0], sizes = [8, 16], strides = [1, 1]} : vector<8x96xf32> to vector<8x16xf32>
    %34 = vector.extract_strided_slice %25 {offsets = [0, 32], sizes = [8, 16], strides = [1, 1]} : vector<8x96xf32> to vector<8x16xf32>
    %35 = vector.extract_strided_slice %25 {offsets = [0, 64], sizes = [8, 16], strides = [1, 1]} : vector<8x96xf32> to vector<8x16xf32>
    %cst_16 = arith.constant dense<0.000000e+00> : vector<8x8xf32>
    %36 = tpu.matmul %33, %34, %cst_16 {dimension_numbers = #tpu.dot_dimension_numbers<[1], [1], [0], [0], [0, 0, 1, 0], [], []>} : vector<8x16xf32>, vector<8x16xf32>, vector<8x8xf32> -> vector<8x8xf32>
    %37 = arith.addf %36, %31 : vector<8x8xf32>
    %cst_17 = arith.constant dense<0xFF800000> : vector<8xf32>
    %38 = vector.multi_reduction <maximumf>, %37, %cst_17 [1] : vector<8x8xf32> to vector<8xf32>
    %39 = vector.shape_cast %38 : vector<8xf32> to vector<8x1xf32>
    %40 = vector.broadcast %39 : vector<8x1xf32> to vector<8x8xf32>
    %41 = arith.subf %37, %40 : vector<8x8xf32>
    %42 = math.exp %41 : vector<8x8xf32>
    %cst_18 = arith.constant dense<0.000000e+00> : vector<8xf32>
    %43 = vector.multi_reduction <add>, %42, %cst_18 [1] : vector<8x8xf32> to vector<8xf32>
    %44 = vector.shape_cast %43 : vector<8xf32> to vector<8x1xf32>
    %45 = tpu.reciprocal %44 {approx = true} : vector<8x1xf32> -> vector<8x1xf32>
    %46 = vector.broadcast %45 : vector<8x1xf32> to vector<8x8xf32>
    %47 = arith.mulf %42, %46 : vector<8x8xf32>
    %cst_19 = arith.constant dense<0.000000e+00> : vector<8x16xf32>
    %48 = tpu.matmul %47, %35, %cst_19 {dimension_numbers = #tpu.dot_dimension_numbers<[1], [0], [0], [1], [0, 0, 1, 1], [], []>} : vector<8x8xf32>, vector<8x16xf32>, vector<8x16xf32> -> vector<8x16xf32>
    %c0_20 = arith.constant 0 : index
    %c0_21 = arith.constant 0 : index
    %c0_22 = arith.constant 0 : index
    %49 = vector.load %arg5[%c0_20, %c0_21, %c0_22] : memref<2x16x32xf32, #tpu.memory_space<vmem>>, vector<1x16x32xf32>
    %50 = vector.shape_cast %49 : vector<1x16x32xf32> to vector<16x32xf32>
    %cst_23 = arith.constant dense<0.000000e+00> : vector<8x32xf32>
    %51 = tpu.matmul %48, %50, %cst_23 {dimension_numbers = #tpu.dot_dimension_numbers<[1], [0], [0], [1], [0, 0, 1, 1], [], []>} : vector<8x16xf32>, vector<16x32xf32>, vector<8x32xf32> -> vector<8x32xf32>
    %52 = arith.addf %32, %51 : vector<8x32xf32>
    %53 = vector.extract_strided_slice %25 {offsets = [0, 16], sizes = [8, 16], strides = [1, 1]} : vector<8x96xf32> to vector<8x16xf32>
    %54 = vector.extract_strided_slice %25 {offsets = [0, 48], sizes = [8, 16], strides = [1, 1]} : vector<8x96xf32> to vector<8x16xf32>
    %55 = vector.extract_strided_slice %25 {offsets = [0, 80], sizes = [8, 16], strides = [1, 1]} : vector<8x96xf32> to vector<8x16xf32>
    %cst_24 = arith.constant dense<0.000000e+00> : vector<8x8xf32>
    %56 = tpu.matmul %53, %54, %cst_24 {dimension_numbers = #tpu.dot_dimension_numbers<[1], [1], [0], [0], [0, 0, 1, 0], [], []>} : vector<8x16xf32>, vector<8x16xf32>, vector<8x8xf32> -> vector<8x8xf32>
    %57 = arith.addf %56, %31 : vector<8x8xf32>
    %cst_25 = arith.constant dense<0xFF800000> : vector<8xf32>
    %58 = vector.multi_reduction <maximumf>, %57, %cst_25 [1] : vector<8x8xf32> to vector<8xf32>
    %59 = vector.shape_cast %58 : vector<8xf32> to vector<8x1xf32>
    %60 = vector.broadcast %59 : vector<8x1xf32> to vector<8x8xf32>
    %61 = arith.subf %57, %60 : vector<8x8xf32>
    %62 = math.exp %61 : vector<8x8xf32>
    %cst_26 = arith.constant dense<0.000000e+00> : vector<8xf32>
    %63 = vector.multi_reduction <add>, %62, %cst_26 [1] : vector<8x8xf32> to vector<8xf32>
    %64 = vector.shape_cast %63 : vector<8xf32> to vector<8x1xf32>
    %65 = tpu.reciprocal %64 {approx = true} : vector<8x1xf32> -> vector<8x1xf32>
    %66 = vector.broadcast %65 : vector<8x1xf32> to vector<8x8xf32>
    %67 = arith.mulf %62, %66 : vector<8x8xf32>
    %cst_27 = arith.constant dense<0.000000e+00> : vector<8x16xf32>
    %68 = tpu.matmul %67, %55, %cst_27 {dimension_numbers = #tpu.dot_dimension_numbers<[1], [0], [0], [1], [0, 0, 1, 1], [], []>} : vector<8x8xf32>, vector<8x16xf32>, vector<8x16xf32> -> vector<8x16xf32>
    %c1 = arith.constant 1 : index
    %c0_28 = arith.constant 0 : index
    %c0_29 = arith.constant 0 : index
    %69 = vector.load %arg5[%c1, %c0_28, %c0_29] : memref<2x16x32xf32, #tpu.memory_space<vmem>>, vector<1x16x32xf32>
    %70 = vector.shape_cast %69 : vector<1x16x32xf32> to vector<16x32xf32>
    %cst_30 = arith.constant dense<0.000000e+00> : vector<8x32xf32>
    %71 = tpu.matmul %68, %70, %cst_30 {dimension_numbers = #tpu.dot_dimension_numbers<[1], [0], [0], [1], [0, 0, 1, 1], [], []>} : vector<8x16xf32>, vector<16x32xf32>, vector<8x32xf32> -> vector<8x32xf32>
    %72 = arith.addf %52, %71 : vector<8x32xf32>
    %73 = arith.addf %23, %72 : vector<8x32xf32>
    %cst_31 = arith.constant dense<0.000000e+00> : vector<8xf32>
    %74 = vector.multi_reduction <add>, %73, %cst_31 [1] : vector<8x32xf32> to vector<8xf32>
    %75 = vector.shape_cast %74 : vector<8xf32> to vector<8x1xf32>
    %cst_32 = arith.constant 3.200000e+01 : f32
    %76 = vector.broadcast %cst_32 : f32 to vector<8x1xf32>
    %77 = arith.divf %75, %76 : vector<8x1xf32>
    %78 = vector.broadcast %77 : vector<8x1xf32> to vector<8x32xf32>
    %79 = arith.subf %73, %78 : vector<8x32xf32>
    %80 = arith.mulf %79, %79 : vector<8x32xf32>
    %cst_33 = arith.constant dense<0.000000e+00> : vector<8xf32>
    %81 = vector.multi_reduction <add>, %80, %cst_33 [1] : vector<8x32xf32> to vector<8xf32>
    %82 = vector.shape_cast %81 : vector<8xf32> to vector<8x1xf32>
    %cst_34 = arith.constant 3.200000e+01 : f32
    %83 = vector.broadcast %cst_34 : f32 to vector<8x1xf32>
    %84 = arith.divf %82, %83 : vector<8x1xf32>
    %cst_35 = arith.constant 9.99999974E-6 : f32
    %85 = vector.broadcast %cst_35 : f32 to vector<8x1xf32>
    %86 = arith.addf %84, %85 : vector<8x1xf32>
    %87 = math.rsqrt %86 : vector<8x1xf32>
    %88 = vector.broadcast %87 : vector<8x1xf32> to vector<8x32xf32>
    %89 = arith.mulf %79, %88 : vector<8x32xf32>
    %c0_36 = arith.constant 0 : index
    %c0_37 = arith.constant 0 : index
    %90 = vector.load %arg6[%c0_36, %c0_37] : memref<1x32xf32, #tpu.memory_space<vmem>>, vector<1x32xf32>
    %91 = vector.broadcast %90 : vector<1x32xf32> to vector<8x32xf32>
    %92 = arith.mulf %89, %91 : vector<8x32xf32>
    %c0_38 = arith.constant 0 : index
    %c0_39 = arith.constant 0 : index
    %93 = vector.load %arg7[%c0_38, %c0_39] : memref<1x32xf32, #tpu.memory_space<vmem>>, vector<1x32xf32>
    %94 = vector.broadcast %93 : vector<1x32xf32> to vector<8x32xf32>
    %95 = arith.addf %92, %94 : vector<8x32xf32>
    %c0_40 = arith.constant 0 : index
    %c0_41 = arith.constant 0 : index
    %96 = vector.load %arg8[%c0_40, %c0_41] : memref<32x128xf32, #tpu.memory_space<vmem>>, vector<32x128xf32>
    %cst_42 = arith.constant dense<0.000000e+00> : vector<8x128xf32>
    %97 = tpu.matmul %95, %96, %cst_42 {dimension_numbers = #tpu.dot_dimension_numbers<[1], [0], [0], [1], [0, 0, 1, 1], [], []>} : vector<8x32xf32>, vector<32x128xf32>, vector<8x128xf32> -> vector<8x128xf32>
    %c0_43 = arith.constant 0 : index
    %c0_44 = arith.constant 0 : index
    %98 = vector.load %arg9[%c0_43, %c0_44] : memref<32x128xf32, #tpu.memory_space<vmem>>, vector<32x128xf32>
    %cst_45 = arith.constant dense<0.000000e+00> : vector<8x128xf32>
    %99 = tpu.matmul %95, %98, %cst_45 {dimension_numbers = #tpu.dot_dimension_numbers<[1], [0], [0], [1], [0, 0, 1, 1], [], []>} : vector<8x32xf32>, vector<32x128xf32>, vector<8x128xf32> -> vector<8x128xf32>
    %cst_46 = arith.constant 0.000000e+00 : f32
    %100 = vector.broadcast %cst_46 : f32 to vector<8x128xf32>
    %101 = arith.subf %100, %97 : vector<8x128xf32>
    %102 = math.exp %101 : vector<8x128xf32>
    %cst_47 = arith.constant 1.000000e+00 : f32
    %103 = vector.broadcast %cst_47 : f32 to vector<8x128xf32>
    %104 = arith.addf %103, %102 : vector<8x128xf32>
    %105 = tpu.reciprocal %104 {approx = true} : vector<8x128xf32> -> vector<8x128xf32>
    %106 = arith.mulf %97, %105 : vector<8x128xf32>
    %107 = arith.mulf %106, %99 : vector<8x128xf32>
    %c0_48 = arith.constant 0 : index
    %c0_49 = arith.constant 0 : index
    %108 = vector.load %arg10[%c0_48, %c0_49] : memref<128x32xf32, #tpu.memory_space<vmem>>, vector<128x32xf32>
    %cst_50 = arith.constant dense<0.000000e+00> : vector<8x32xf32>
    %109 = tpu.matmul %107, %108, %cst_50 {dimension_numbers = #tpu.dot_dimension_numbers<[1], [0], [0], [1], [0, 0, 1, 1], [], []>} : vector<8x128xf32>, vector<128x32xf32>, vector<8x32xf32> -> vector<8x32xf32>
    %110 = arith.addf %95, %109 : vector<8x32xf32>
    %c0_51 = arith.constant 0 : index
    %c0_52 = arith.constant 0 : index
    %c0_53 = arith.constant 0 : index
    %111 = vector.load %arg11[%c0_51, %c0_52, %c0_53] : memref<1x8x32xf32, #tpu.memory_space<vmem>>, vector<1x8x32xf32>
    %112 = vector.shape_cast %111 : vector<1x8x32xf32> to vector<8x32xf32>
    %113 = vector.shape_cast %110 : vector<8x32xf32> to vector<1x8x32xf32>
    tpu.vector_store %arg11[%c0_51, %c0_52, %c0_53], %113 {strides = array<i32>} : memref<1x8x32xf32, #tpu.memory_space<vmem>>, vector<1x8x32xf32>,
    return
  }
  func.func @transform_0(%arg0: i32) -> (i32, i32, i32) {
    %c0_i32 = arith.constant 0 : i32
    %c0_i32_0 = arith.constant 0 : i32
    %c0_i32_1 = arith.constant 0 : i32
    return %arg0, %c0_i32, %c0_i32_0 : i32, i32, i32
  }
  func.func @transform_1(%arg0: i32) -> (i32, i32) {
    %c0_i32 = arith.constant 0 : i32
    %c0_i32_0 = arith.constant 0 : i32
    %c0_i32_1 = arith.constant 0 : i32
    return %c0_i32, %c0_i32_0 : i32, i32
  }
  func.func @transform_2(%arg0: i32) -> (i32, i32) {
    %c0_i32 = arith.constant 0 : i32
    %c0_i32_0 = arith.constant 0 : i32
    %c0_i32_1 = arith.constant 0 : i32
    return %c0_i32, %c0_i32_0 : i32, i32
  }
  func.func @transform_3(%arg0: i32) -> (i32, i32) {
    %c0_i32 = arith.constant 0 : i32
    %c0_i32_0 = arith.constant 0 : i32
    %c0_i32_1 = arith.constant 0 : i32
    return %c0_i32, %c0_i32_0 : i32, i32
  }
  func.func @transform_4(%arg0: i32) -> (i32, i32, i32) {
    %c0_i32 = arith.constant 0 : i32
    %c0_i32_0 = arith.constant 0 : i32
    %c0_i32_1 = arith.constant 0 : i32
    %c0_i32_2 = arith.constant 0 : i32
    return %c0_i32, %c0_i32_0, %c0_i32_1 : i32, i32, i32
  }
  func.func @transform_5(%arg0: i32) -> (i32, i32) {
    %c0_i32 = arith.constant 0 : i32
    %c0_i32_0 = arith.constant 0 : i32
    %c0_i32_1 = arith.constant 0 : i32
    return %c0_i32, %c0_i32_0 : i32, i32
  }
  func.func @transform_6(%arg0: i32) -> (i32, i32) {
    %c0_i32 = arith.constant 0 : i32
    %c0_i32_0 = arith.constant 0 : i32
    %c0_i32_1 = arith.constant 0 : i32
    return %c0_i32, %c0_i32_0 : i32, i32
  }
  func.func @transform_7(%arg0: i32) -> (i32, i32) {
    %c0_i32 = arith.constant 0 : i32
    %c0_i32_0 = arith.constant 0 : i32
    %c0_i32_1 = arith.constant 0 : i32
    return %c0_i32, %c0_i32_0 : i32, i32
  }
  func.func @transform_8(%arg0: i32) -> (i32, i32) {
    %c0_i32 = arith.constant 0 : i32
    %c0_i32_0 = arith.constant 0 : i32
    %c0_i32_1 = arith.constant 0 : i32
    return %c0_i32, %c0_i32_0 : i32, i32
  }
  func.func @transform_9(%arg0: i32) -> (i32, i32) {
    %c0_i32 = arith.constant 0 : i32
    %c0_i32_0 = arith.constant 0 : i32
    %c0_i32_1 = arith.constant 0 : i32
    return %c0_i32, %c0_i32_0 : i32, i32
  }
  func.func @transform_10(%arg0: i32) -> (i32, i32, i32) {
    %c0_i32 = arith.constant 0 : i32
    %c0_i32_0 = arith.constant 0 : i32
    %c0_i32_1 = arith.constant 0 : i32
    return %arg0, %c0_i32, %c0_i32_0 : i32, i32, i32
  }
}

</mosaic_0001>

<bundles_post_ra>
// kernel: tpu_custom_call.1
= control target key start
LH: loop header
LB: loop body
LE: loop exit
PB: predicated region body
PF: predicated region fallthrough
CT: control target
= control target key end

     0   :  { %15 = vsyncpa [#allocation3], 0  ;;  %s1994_s0 = inlined_call_operand.vmem [shape: f32[2,8,32], index: 0, kind: input, shape index: {}]   ;;  %s1995_s1 = inlined_call_operand.vmem [shape: f32[1,32], index: 1, kind: input, shape index: {}]   ;;  %s1996_s2 = inlined_call_operand.vmem [shape: f32[1,32], index: 2, kind: input, shape index: {}]   ;;  %s1997_s3 = inlined_call_operand.vmem [shape: f32[32,96], index: 3, kind: input, shape index: {}]   ;;  %s1998_s4 = inlined_call_operand.vmem [shape: f32[2,16,32], index: 4, kind: input, shape index: {}]   ;;  %s1999_s5 = inlined_call_operand.vmem [shape: f32[1,32], index: 5, kind: input, shape index: {}]   ;;  %s2000_s6 = inlined_call_operand.vmem [shape: f32[1,32], index: 6, kind: input, shape index: {}]   ;;  %s2001_s7 = inlined_call_operand.vmem [shape: f32[32,128], index: 7, kind: input, shape index: {}]   ;;  %s2002_s8 = inlined_call_operand.vmem [shape: f32[32,128], index: 8, kind: input, shape index: {}]   ;;  %s2003_s9 = inlined_call_operand.vmem [shape: f32[128,32], index: 9, kind: input, shape index: {}]   ;;  %s2004_s10 = inlined_call_operand.hbm [shape: f32[2,8,32], index: 10, kind: output, shape index: {}]  }
   0x1   :  { %17 = vsyncpa [#allocation3 + $0x1], 0  ;;  %s1717_s13 = smov 0   ;;  %s1719_s14 = smov 0  }
   0x2   :  { %s1721_s15 = smov 0   ;;  %s1723_s16 = smov 0  }
   0x3 LB: > { %s1738_s17 = sadd.s32 4294967295, %s1650_s16   ;;  %s1301_s18 = sadd.s32 4294967294, %s1650_s16   ;;  %s1650_s16 = sphi %s1723_s16, %s2010_s16   ;;  %s1646_s15 = sphi %s1721_s15, %s2009_s15   ;;  %s1642_s14 = sphi %s1719_s14, %s2008_s14   ;;  %s1638_s13 = sphi %s1717_s13, %s2007_s13  }
   0x4   : > { %s1742_s19 = sadd.s32 1, %s1650_s16   ;;  %s245_s20 = sadd.s32 1, %s1646_s15 }
   0x5   : > { %s242_s21 = ssub.s32 %s1650_s16, %s1742_s19  ;;  %p255_p0 = scmp.ne.s32.totalorder %s1646_s15, %s1642_s14 }
   0x6   : > { %p243_p1 = scmp.eq.s32.totalorder %s242_s21, 0  ;;  %p256_p2 = scmp.eq.s32.totalorder %s1738_s17, 1 }
   0x7   : > { %p261_p3 = scmp.ne.s32.totalorder %s1642_s14, %s1638_s13  ;;  %p262_p4 = scmp.eq.s32.totalorder %s1301_s18, 1 }
   0x8   : > { %s1753_s22 = scalar_select %p243_p1, %s1646_s15, %s245_s20  }
   0x9   : > { %p1755_p5 = por %p256_p2, %p255_p0  ;;  %p1759_p6 = por %p262_p4, %p261_p3 }
   0xa   : > { %p1304_p7 = scmp.ge.s32.totalorder %s1650_s16, 1  ;;  %p314_p8 = scmp.lt.s32.totalorder %s1650_s16, 3 }
   0xc   : > { %p315_p9 = pnand %p1304_p7, %p314_p8 }
   0xd   : > { %p351_p10 = scmp.lt.s32.totalorder (!%p315_p9), %s1738_s17, 1  ;;  %vm356_vm0 = vcmask (!%p315_p9), 261120   ;;  %v387_v7 = vld [vmem:[%s1997_s3] sm:$0xff] (!%p315_p9)  ;;  %v388_v8 = vld [vmem:[%s1997_s3 + $0x8] sm:$0xff] (!%p315_p9)  ;;  %v389_v9 = vld [vmem:[%s1997_s3 + $0x10] sm:$0xff] (!%p315_p9)  ;;  %v1652_v10 = vmov (!%p315_p9), 0.0|0.0   ;;  %v464_v29 = vlaneseq (!%p315_p9) }
   0xe   : > { %318 = sbr.rel (%p315_p9) target bundleno = 2414 (0x96e), region = 60  ;;  %1476 = vmatprep.subr.bf16.mxu1 (!%p315_p9), %v1652_v10  ;;  %v1477_v11 = vpack.c.bf16 (!%p315_p9), %v388_v8, %v387_v7  ;;  %v390_v12 = vld [vmem:[%s1997_s3 + $0x18] sm:$0xff] (!%p315_p9)  ;;  %vm1653_vm1 = vmmov (!%p315_p9), 0   ;;  %v1654_v13 = vmov (!%p315_p9), 0.0   ;;  %v1307_v19 = vld [vmem:[%s1995_s1] ss:$0 sm:$0xff] (!%p315_p9) }
   0xf   : > { %1382 = vmatprep.mubr.msk.f32.mxu1 (!%p315_p9), %vm1653_vm1, %v1654_v13  ;;  %1395 = vmatprep.subr.mxu0 (!%p315_p9), %v1654_v13  ;;  %v1480_v14 = vpack.c.bf16 (!%p315_p9), %v390_v12, %v389_v9  ;;  %v1308_v21 = vld [vmem:[%s1996_s2] ss:$0 sm:$0xff] (!%p315_p9)  ;;  %s1655_s11 = smov (!%p315_p9), 112   ;;  %s1656_s12 = smov (!%p315_p9), 96   ;;  %vm473_vm2 = vcmask (!%p315_p9), 130048   ;;  %v465_v30 = vshrl.u32 (!%p315_p9), %v464_v29, 7 }
  0x10   : > { %1397 = vmatprep.mubr.msk.f32.mxu0 (!%p315_p9), %vm1653_vm1, %v1654_v13  ;;  %1478 = vmatpush3.bf16.msra.mxu1 (!%p315_p9), %v1477_v11  ;;  %s1657_s18 = smov (!%p315_p9), 80   ;;  %v467_v31 = vand.u32 (!%p315_p9), 127, %v464_v29  ;;  %v1658_v32 = vmov (!%p315_p9), -1e+30   ;;  %vm548_vm4 = vcmask (!%p315_p9), 64512   ;;  %s1659_s20 = smov (!%p315_p9), 48  }
  0x11   : > { %1479 = vmatprep.subr.bf16.mxu1 (!%p315_p9), %v1652_v10  ;;  %s1660_s21 = smov (!%p315_p9), 64   ;;  %v636_v57 = vld [vmem:[%s1998_s4] sm:$0xff] (!%p315_p9)  ;;  %v637_v58 = vld [vmem:[%s1998_s4 + $0x8] sm:$0xff] (!%p315_p9)  ;;  %v1316_v63 = vld [vmem:[%s1998_s4 + $0x10] sm:$0xff] (!%p315_p9)  ;;  %s348_s30 = sand.u32 (!%p315_p9), 1, %s1642_s14  }
  0x12   : > { %vm468_vm3 = vcmp.le.s32.totalorder (!%p315_p9), %v467_v31, %v465_v30  ;;  %v1486_v61 = vpack.c.bf16 (!%p315_p9), %v637_v58, %v636_v57  ;;  %v1320_v30 = vld [vmem:[%s1999_s5] ss:$0 sm:$0xff] (!%p315_p9)  ;;  %s1229_s27 = scalar_lea.sflag (!%p315_p9), [#allocation3], %s348_s30  ;;  %s1661_s28 = smov (!%p315_p9), [#allocation2]  }
  0x13   : > { %v469_v33 = vsel (!%p315_p9), %vm468_vm3, 0.0, %v1658_v32  ;;  %v1059_v32 = vld [vmem:[%s2002_s8] sm:$0xff] (!%p315_p9) }
  0x14   : > { %1481 = vmatpush3.bf16.msra.mxu1 (!%p315_p9), %v1480_v14  ;;  %v1152_v58 = vld [vmem:[%s2003_s9 + $0x60] sm:$0xff] (!%p315_p9) }
  0x15   : > { %s352_s25 = scalar_select %p351_p10, %s1738_s17, 1  ;;  %1385 = vmatprep.subr.mxu1 %v1654_v13 }
  0x17   : > { %s1306_s26 = sshll.u32 %s352_s25, 3 }
  0x18   : > { %s354_s29 = scalar_lea.vmem %s1994_s0, %s1306_s26 }
  0x19   : > { %v355_v0 = vld [vmem:[%s354_s29] sm:$0xff]  ;;  %s1592_s29 = sshll.u32 %s1661_s28, 4  ;;  %s1593_s29 = int_to_ptr.vmem [resolvable:$false] %s1592_s29 }
  0x1a   : > { %v357_v1 = vsel %vm356_vm0, %v355_v0, 0.0 }
  0x1b   : > { %358 = vadd.xlane.f32.xlu0 %v357_v1 }
  0xa8   : > { %v359_v2 = vpop.xlane.xlu0 %358 }
  0xa9   : > { %v361_v3 = vmul.f32 0.03125, %v359_v2 }
  0xab   : > { %v362_v4 = vsub.f32 %v355_v0, %v361_v3  ;;  %v1317_v0 = vld [vmem:[%s1998_s4 + $0x18] sm:$0xff] }
  0xac   : > { %v1483_v1 = vpack.c.bf16 %v1317_v0, %v1316_v63 }
  0xad   : > { %v363_v5 = vmul.f32 %v362_v4, %v362_v4 }
  0xaf   : > { %v364_v6 = vsel %vm356_vm0, %v363_v5, 0.0 }
  0xb0   : > { %365 = vadd.xlane.f32.xlu0 %v364_v6 }
 0x13d   : > { %v366_v15 = vpop.xlane.xlu0 %365 }
 0x13e   : > { %v367_v16 = vmul.f32 0.03125, %v366_v15 }
 0x140   : > { %v368_v17 = vadd.f32 1e-05, %v367_v16 }
 0x142   : > { %1572 = vrsqrt.f32 %v368_v17 }
 0x14c   : > { %v1573_v18 = vpop.eup %1572 }
 0x14d   : > { %v370_v20 = vmul.f32 %v1573_v18, %v362_v4 }
 0x14f   : > { %v378_v22 = vmul.f32 %v1307_v19, %v370_v20  ;;  %v982_v20 = vld [vmem:[%s2001_s7] sm:$0xff] }
 0x151   : > { %v1798_v23 = vadd.f32 %v1308_v21, %v378_v22  ;;  %v983_v21 = vld [vmem:[%s2001_s7 + $0x8] sm:$0xff] }
 0x152   : > { %v1489_v22 = vpack.c.bf16 %v983_v21, %v982_v20 }
 0x153   : > { %1383 = vmatmul.mubr.msk.f32.vlgmr.msra.gmra.mrb[0].mxu1 %vm356_vm0, %v1798_v23 }
 0x154   : > { %1387 = vmatprep.mubr.msk.f32.mxu1 %vm1653_vm1, %v1654_v13 }
 0x226   : > { %v460_v24 = vpop.f32.mrb[0].mxu1 }
 0x227   : > { %638 = vrot.lane.b32.xlu0 %v460_v24, %s1655_s11  ;;  %471 = vrot.lane.b32.xlu1 %v460_v24, %s1656_s12  ;;  %v1384_v25 = vpop.f32.mrb[1].mxu1  ;;  %s1305_s11 = sshll.u32 %s348_s30, 3  ;;  %s1325_s12 = sshll.u32 %s1738_s17, 7 }
 0x228   : > { %s1951_s26 = scalar_lea.hbm %s2004_s10, %s1325_s12 }
 0x22b   : > { %640 = vrot.lane.b32.xlu1 %v460_v24, %s1657_s18  ;;  %s350_s18 = scalar_lea.vmem [#allocation2], %s1305_s11  ;;  %s1594_s11 = scalar_lea.vmem %s1593_s29, 256 }
 0x299   : > { %v472_v26 = vpop.permute.xlu1 %471  ;;  %v639_v28 = vpop.permute.xlu0 %638 }
 0x29a   : > { %1386 = vmatpush3.xpose.msk.msra.mxu1 %vm473_vm2, %v472_v26 }
 0x29b   : > { %1390 = vmatprep.subr.mxu1 %v1654_v13 }
 0x29d   : > { %1388 = vmatmul.mubr.msk.f32.vlgmr.msra.gmra.mrb[2].mxu1 %vm473_vm2, %v460_v24  ;;  %v641_v27 = vpop.permute.xlu1 %640 }
 0x29e   : > { %1396 = vmatpush3.xpose.msk.msra.mxu0 %vm473_vm2, %v641_v27  ;;  %1392 = vmatprep.mubr.msk.f32.mxu1 %vm1653_vm1, %v1654_v13 }
 0x29f   : > { %1482 = vmatprep.subr.bf16.mxu0 %v1652_v10 }
 0x2a1   : > { %1398 = vmatmul.mubr.msk.f32.vlgmr.msra.gmra.mrb[0].mxu0 %vm473_vm2, %v639_v28 }
 0x2a2   : > { %1409 = vmatprep.mubr.msk.f32.mxu0 %vm1653_vm1, %v1654_v13  ;;  %1484 = vmatpush3.bf16.msra.mxu0 %v1483_v1 }
 0x2a3   : > { %1500 = vmatprep.subr.bf16.mxu0 %v1652_v10 }
 0x370   : > { %v544_v34 = vpop.f32.mrb[2].mxu1 }
 0x371   : > { %v545_v35 = vadd.f32 %v544_v34, %v469_v33  ;;  %v1389_v36 = vpop.f32.mrb[3].mxu1  ;;  %v1321_v34 = vld [vmem:[%s2000_s6] ss:$0 sm:$0xff] }
 0x373   : > { %v549_v37 = vsel %vm548_vm4, %v545_v35, -inf }
 0x374   : > { %v712_v38 = vpop.f32.mrb[0].mxu0  ;;  %550 = vmax.xlane.f32.xlu1 %v549_v37 }
 0x375   : > { %v713_v39 = vadd.f32 %v712_v38, %v469_v33  ;;  %v1399_v40 = vpop.f32.mrb[1].mxu0  ;;  %v1060_v33 = vld [vmem:[%s2002_s8 + $0x8] sm:$0xff]  ;;  %v1061_v38 = vld [vmem:[%s2002_s8 + $0x10] sm:$0xff] }
 0x376   : > { %v1495_v36 = vpack.c.bf16 %v1060_v33, %v1059_v32 }
 0x377   : > { %v716_v41 = vsel %vm548_vm4, %v713_v39, -inf }
 0x378   : > { %717 = vmax.xlane.f32.xlu0 %v716_v41  ;;  %v1140_v41 = vld [vmem:[%s2003_s9] sm:$0xff] }
 0x38e   : > { %727 = vrot.lane.b32.xlu0 %v460_v24, %s1659_s20  ;;  %s1242_s20 = sshll.u32 %s350_s18, 4  ;;  %s1953_s20 = int_to_ptr.vmem [resolvable:$true] %s1242_s20 }
 0x38f   : > { %s1588_s17 = scalar_lea.vmem %s1953_s20, 128  ;;  %p1595_p0 = scmp.lt.s32.totalorder %s1953_s20, %s1593_s29 }
 0x390   : > { %p1589_p11 = scmp.ne.s32.totalorder %s1953_s20, %s1588_s17  ;;  %p1596_p1 = scmp.lt.s32.totalorder %s1594_s11, %s1588_s17 }
 0x392   : > { %p1590_p12 = pnand %p1589_p11, %p1755_p5  ;;  %p1597_p2 = por %p1596_p1, %p1595_p0 }
 0x394   : > { %p1591_p13 = pneg %p1590_p12 }
 0x396   : > { %p1598_p3 = pnand %p1597_p2, %p1591_p13 }
 0x401   : > { %v551_v42 = vpop.xlane.xlu1 %550 }
 0x402   : > { %v552_v43 = vsub.f32 %v545_v35, %v551_v42  ;;  %v1141_v42 = vld [vmem:[%s2003_s9 + $0x8] sm:$0xff] }
 0x404   : > { %v553_v44 = vmul.f32 1.442695, %v552_v43  ;;  %v1501_v43 = vpack.c.bf16 %v1141_v42, %v1140_v41 }
 0x405   : > { %v718_v45 = vpop.xlane.xlu0 %717 }
 0x406   : > { %1574 = vpow2.f32 %v553_v44  ;;  %v719_v46 = vsub.f32 %v713_v39, %v718_v45  ;;  %v1062_v39 = vld [vmem:[%s2002_s8 + $0x18] sm:$0xff] }
 0x407   : > { %v1498_v40 = vpack.c.bf16 %v1062_v39, %v1061_v38  ;;  %v1143_v44 = vld [vmem:[%s2003_s9 + $0x18] sm:$0xff] }
 0x408   : > { %v720_v47 = vmul.f32 1.442695, %v719_v46  ;;  %v1144_v46 = vld [vmem:[%s2003_s9 + $0x20] sm:$0xff] }
 0x409   : > { %v728_v59 = vpop.permute.xlu0 %727 }
 0x40a   : > { %1576 = vpow2.f32 %v720_v47  ;;  %v1145_v47 = vld [vmem:[%s2003_s9 + $0x28] sm:$0xff] }
 0x410   : > { %v1575_v48 = vpop.eup %1574 }
 0x411   : > { %v555_v49 = vsel %vm548_vm4, %v1575_v48, 0.0 }
 0x412   : > { %556 = vadd.xlane.f32.xlu1 %v555_v49  ;;  %v1146_v49 = vld [vmem:[%s2003_s9 + $0x30] sm:$0xff] }
 0x414   : > { %v1577_v50 = vpop.eup %1576 }
 0x415   : > { %v722_v51 = vsel %vm548_vm4, %v1577_v50, 0.0 }
 0x416   : > { %723 = vadd.xlane.f32.xlu1 %v722_v51 }
 0x427   : > { %560 = vrot.lane.b32.xlu1 %v460_v24, %s1660_s21  ;;  %v985_v24 = vld [vmem:[%s2001_s7 + $0x18] sm:$0xff] }
 0x49f   : > { %v557_v52 = vpop.xlane.xlu1 %556 }
 0x4a0   : > { %1578 = vrcp.f32 %v557_v52  ;;  %v1148_v52 = vld [vmem:[%s2003_s9 + $0x40] sm:$0xff] }
 0x4a3   : > { %v724_v53 = vpop.xlane.xlu1 %723 }
 0x4a4   : > { %1580 = vrcp.f32 %v724_v53  ;;  %v1149_v53 = vld [vmem:[%s2003_s9 + $0x48] sm:$0xff] }
 0x4a7   : > { %v561_v54 = vpop.permute.xlu1 %560 }
 0x4a8   : > { %1391 = vmatpush3.msra.mxu1 %v561_v54  ;;  %v1513_v54 = vpack.c.bf16 %v1149_v53, %v1148_v52 }
 0x4a9   : > { %1400 = vmatprep.subr.mxu1 %v1654_v13 }
 0x4aa   : > { %v1579_v55 = vpop.eup %1578 }
 0x4ab   : > { %v559_v56 = vmul.f32 %v1579_v55, %v1575_v48  ;;  %v1507_v48 = vpack.c.bf16 %v1145_v47, %v1144_v46  ;;  %v1150_v55 = vld [vmem:[%s2003_s9 + $0x50] sm:$0xff] }
 0x4ad   : > { %1393 = vmatmul.mubr.msk.f32.vlgmr.msra.gmra.mrb[4].mxu1 %vm548_vm4, %v559_v56  ;;  %v1151_v56 = vld [vmem:[%s2003_s9 + $0x58] sm:$0xff] }
 0x4ae   : > { %v1581_v60 = vpop.eup %1580  ;;  %1401 = vmatpush3.msra.mxu1 %v728_v59  ;;  %1402 = vmatprep.mubr.msk.f32.mxu1 %vm1653_vm1, %v1654_v13  ;;  %v1516_v57 = vpack.c.bf16 %v1151_v56, %v1150_v55  ;;  %v1153_v59 = vld [vmem:[%s2003_s9 + $0x68] sm:$0xff] }
 0x4af   : > { %v726_v62 = vmul.f32 %v1581_v60, %v1577_v50  ;;  %1485 = vmatprep.subr.bf16.mxu1 %v1652_v10  ;;  %v1147_v50 = vld [vmem:[%s2003_s9 + $0x38] sm:$0xff]  ;;  %v1519_v60 = vpack.c.bf16 %v1153_v59, %v1152_v58 }
 0x4b0   : > { %v1510_v51 = vpack.c.bf16 %v1147_v50, %v1146_v49 }
 0x4b1   : > { %1403 = vmatmul.mubr.msk.f32.vlgmr.msra.gmra.mrb[6].mxu1 %vm548_vm4, %v726_v62  ;;  %v1155_v62 = vld [vmem:[%s2003_s9 + $0x78] sm:$0xff] }
 0x4b2   : > { %1487 = vmatpush3.bf16.msra.mxu1 %v1486_v61  ;;  %1416 = vmatprep.mubr.msk.f32.mxu1 %vm1653_vm1, %v1654_v13  ;;  %v1154_v61 = vld [vmem:[%s2003_s9 + $0x70] sm:$0xff] }
 0x4b3   : > { %1488 = vmatprep.subr.bf16.mxu1 %v1652_v10  ;;  %v1522_v63 = vpack.c.bf16 %v1155_v62, %v1154_v61 }
 0x580   : > { %v632_v2 = vpop.f32.mrb[4].mxu1 }
 0x581   : > { %v1394_v3 = vpop.f32.mrb[5].mxu1  ;;  %1417 = vmatmul.mubr.msk.f32.vlgmr.msra.gmra.mrb[8].mxu1 %vm473_vm2, %v632_v2 }
 0x582   : > { %1427 = vmatprep.mubr.msk.f32.mxu1 %vm1653_vm1, %v1654_v13  ;;  %1490 = vmatpush3.bf16.msra.mxu1 %v1489_v22 }
 0x583   : > { %1491 = vmatprep.subr.bf16.mxu1 %v1652_v10 }
 0x584   : > { %v799_v4 = vpop.f32.mrb[6].mxu1 }
 0x585   : > { %v1404_v5 = vpop.f32.mrb[7].mxu1  ;;  %1410 = vmatmul.mubr.msk.f32.vlgmr.msra.gmra.mrb[2].mxu0 %vm473_vm2, %v799_v4 }
 0x586   : > { %1473 = vmatprep.mubr.msk.f32.mxu0 %vm1653_vm1, %v1654_v13  ;;  %1502 = vmatpush3.bf16.msra.mxu0 %v1501_v43 }
 0x587   : > { %1503 = vmatprep.subr.bf16.mxu0 %v1652_v10 }
 0x654   : > { %v948_v6 = vpop.f32.mrb[8].mxu1 }
 0x655   : > { %v1418_v7 = vpop.f32.mrb[9].mxu1 }
 0x658   : > { %v875_v8 = vpop.f32.mrb[2].mxu0 }
 0x659   : > { %v949_v9 = vadd.f32 %v948_v6, %v875_v8  ;;  %v1411_v11 = vpop.f32.mrb[3].mxu0 }
 0x65b   : > { %v952_v12 = vadd.f32 %v949_v9, %v1798_v23  ;;  %v984_v23 = vld [vmem:[%s2001_s7 + $0x10] sm:$0xff] }
 0x65c   : > { %v1492_v25 = vpack.c.bf16 %v985_v24, %v984_v23 }
 0x65d   : > { %v953_v14 = vsel %vm356_vm0, %v952_v12, 0.0 }
 0x65e   : > { %954 = vadd.xlane.f32.xlu1 %v953_v14  ;;  %1493 = vmatpush3.bf16.msra.mxu1 %v1492_v25 }
 0x65f   : > { %1494 = vmatprep.subr.bf16.mxu1 %v1652_v10 }
 0x6eb   : > { %v955_v15 = vpop.xlane.xlu1 %954 }
 0x6ec   : > { %v956_v16 = vmul.f32 0.03125, %v955_v15 }
 0x6ee   : > { %v957_v17 = vsub.f32 %v952_v12, %v956_v16 }
 0x6f0   : > { %v958_v18 = vmul.f32 %v957_v17, %v957_v17 }
 0x6f2   : > { %v959_v19 = vsel %vm356_vm0, %v958_v18, 0.0 }
 0x6f3   : > { %960 = vadd.xlane.f32.xlu0 %v959_v19 }
 0x780   : > { %v961_v26 = vpop.xlane.xlu0 %960 }
 0x781   : > { %v962_v27 = vmul.f32 0.03125, %v961_v26 }
 0x783   : > { %v963_v28 = vadd.f32 1e-05, %v962_v27 }
 0x785   : > { %1582 = vrsqrt.f32 %v963_v28 }
 0x78f   : > { %v1583_v29 = vpop.eup %1582 }
 0x790   : > { %v965_v31 = vmul.f32 %v1583_v29, %v957_v17 }
 0x792   : > { %v973_v35 = vmul.f32 %v1320_v30, %v965_v31 }
 0x794   : > { %v1875_v37 = vadd.f32 %v1321_v34, %v973_v35 }
 0x796   : > { %1428 = vmatmul.mubr.msk.f32.vlgmr.msra.gmra.mrb[10].mxu1 %vm356_vm0, %v1875_v37 }
 0x797   : > { %1496 = vmatpush3.bf16.msra.mxu1 %v1495_v36  ;;  %1438 = vmatprep.mubr.msk.f32.mxu1 %vm1653_vm1, %v1654_v13  ;;  %v1142_v13 = vld [vmem:[%s2003_s9 + $0x10] sm:$0xff] }
 0x798   : > { %1497 = vmatprep.subr.bf16.mxu1 %v1652_v10  ;;  %v1504_v45 = vpack.c.bf16 %v1143_v44, %v1142_v13 }
 0x79a   : > { %1505 = vmatpush3.bf16.msra.mxu0 %v1504_v45 }
 0x79b   : > { %1499 = vmatpush3.bf16.msra.mxu1 %v1498_v40  ;;  %1506 = vmatprep.subr.bf16.mxu0 %v1652_v10 }
 0x79e   : > { %1439 = vmatmul.mubr.msk.f32.vlgmr.msra.gmra.mrb[12].mxu1 %vm356_vm0, %v1875_v37  ;;  %1508 = vmatpush3.bf16.msra.mxu0 %v1507_v48 }
 0x79f   : > { %1509 = vmatprep.subr.bf16.mxu0 %v1652_v10 }
 0x7a2   : > { %1511 = vmatpush3.bf16.msra.mxu0 %v1510_v51 }
 0x7a3   : > { %1512 = vmatprep.subr.bf16.mxu0 %v1652_v10 }
 0x7a6   : > { %1514 = vmatpush3.bf16.msra.mxu0 %v1513_v54 }
 0x7a7   : > { %1515 = vmatprep.subr.bf16.mxu0 %v1652_v10 }
 0x7aa   : > { %1517 = vmatpush3.bf16.msra.mxu0 %v1516_v57 }
 0x7ab   : > { %1518 = vmatprep.subr.bf16.mxu0 %v1652_v10 }
 0x7ae   : > { %1520 = vmatpush3.bf16.msra.mxu0 %v1519_v60 }
 0x7af   : > { %1521 = vmatprep.subr.bf16.mxu0 %v1652_v10 }
 0x7b2   : > { %1523 = vmatpush3.bf16.msra.mxu0 %v1522_v63 }
 0x869   : > { %v1055_v0 = vpop.f32.mrb[10].mxu1 }
 0x86a   : > { %v1133_v1 = vsub.f32 0.0, %v1055_v0  ;;  %v1429_v2 = vpop.f32.mrb[11].mxu1 }
 0x86c   : > { %v1134_v3 = vmul.f32 1.442695, %v1133_v1 }
 0x86e   : > { %1584 = vpow2.f32 %v1134_v3 }
 0x871   : > { %v1129_v4 = vpop.f32.mrb[12].mxu1 }
 0x872   : > { %v1440_v5 = vpop.f32.mrb[13].mxu1 }
 0x878   : > { %v1585_v10 = vpop.eup %1584 }
 0x879   : > { %v1136_v6 = vadd.f32 1.0, %v1585_v10 }
 0x87b   : > { %1586 = vrcp.f32 %v1136_v6 }
 0x885   : > { %v1587_v7 = vpop.eup %1586 }
 0x886   : > { %v1138_v8 = vmul.f32 %v1587_v7, %v1055_v0 }
 0x888   : > { %v1139_v9 = vmul.f32 %v1138_v8, %v1129_v4 }
 0x88a   : > { %1474 = vmatmul.mubr.f32.vlgmr.msra.gmra.mrb[4].mxu0 %v1139_v9 }
 0x95d   : > { %v1222_v11 = vpop.f32.mrb[4].mxu0 }
 0x95e   : > { %v1226_v12 = vadd.f32 %v1222_v11, %v1875_v37  ;;  %v1475_v14 = vpop.f32.mrb[5].mxu0 }
 0x960   : > { %1227 = vst.msk [vmem:[%s350_s18] sm:$0xff] %vm356_vm0, %v1226_v12 }
 0x961   : > { %1601 = shalt.err (!%p1598_p3)
}
 0x962   : > { %s1602_s30 = scalar_lea.hbm %s1951_s26, 128  ;;  %s1606_s21 = scalar_lea.hbm %s2004_s10, 256 }
 0x963   : > { %p1603_p4 = scmp.ne.s32.totalorder %s1951_s26, %s1602_s30  ;;  %p1607_p9 = scmp.lt.u32.totalorder %s1951_s26, %s2004_s10 }
 0x964   : > { %p1608_p10 = scmp.lt.u32.totalorder %s1606_s21, %s1602_s30  ;;  %p1610_p12 = scmp.lt.u32.totalorder %s1602_s30, %s1951_s26 }
 0x965   : > { %p1604_p7 = pnand %p1603_p4, %p1755_p5 }
 0x966   : > { %p1609_p11 = por %p1608_p10, %p1607_p9 }
 0x967   : > { %p1605_p8 = pneg %p1604_p7 }
 0x968   : > { %p1611_p13 = por %p1610_p12, %p1609_p11 }
 0x96a   : > { %p1612_p0 = pnand %p1611_p13, %p1605_p8 }
 0x96c   : > { %1615 = shalt.err (!%p1612_p0)
}
 0x96d   : > { %1524 = dma.vmem_to_hbm [thread:$0]  (%p1755_p5), %s1953_s20, 128, %s1951_s26, %s1229_s27  }
 0x96e PF: > { %p1530_p1 = scmp.ge.s32.totalorder %s1650_s16, 2  ;;  %s1254_s17 = sand.u32 1, %s1638_s13  }
 0x96f   : > { %s1255_s29 = scalar_lea.sflag [#allocation3], %s1254_s17 }
 0x970   : > { %p1527_p2 = pnand %p1530_p1, %p1759_p6 }
 0x972   : > { %1633 = dma.done.wait (!%p1527_p2), %s1255_s29, 128  }
 0x973   : > { %1635 = vsyncadd (!%p1527_p2), %s1255_s29, 4294967168  ;;  %p20_p3 = scmp.ge.s32.totalorder %s1742_s19, 4   ;;  %s2007_s13 = smov %s1642_s14 }
 0x974   : > { %s2008_s14 = smov %s1646_s15  ;;  %s2009_s15 = smov %s1753_s22 }
 0x975   : > { %s2010_s16 = smov %s1742_s19  ;;  %22 = sbr.rel (!%p20_p3) target bundleno = 3 (0x3), region = 96 }
 0x97c   :  { %1260 = vsyncpa [#allocation3], 1 }
 0x97d   :  { %1262 = vsyncpa [#allocation3 + $0x1], 1 }

// kernel: tpu_custom_call.1
= control target key start
LH: loop header
LB: loop body
LE: loop exit
PB: predicated region body
PF: predicated region fallthrough
CT: control target
= control target key end

     0   :  { %15 = vsyncpa [#allocation3], 0  ;;  %s1994_s0 = inlined_call_operand.vmem [shape: f32[2,8,32], index: 0, kind: input, shape index: {}]   ;;  %s1995_s1 = inlined_call_operand.vmem [shape: f32[1,32], index: 1, kind: input, shape index: {}]   ;;  %s1996_s2 = inlined_call_operand.vmem [shape: f32[1,32], index: 2, kind: input, shape index: {}]   ;;  %s1997_s3 = inlined_call_operand.vmem [shape: f32[32,96], index: 3, kind: input, shape index: {}]   ;;  %s1998_s4 = inlined_call_operand.vmem [shape: f32[2,16,32], index: 4, kind: input, shape index: {}]   ;;  %s1999_s5 = inlined_call_operand.vmem [shape: f32[1,32], index: 5, kind: input, shape index: {}]   ;;  %s2000_s6 = inlined_call_operand.vmem [shape: f32[1,32], index: 6, kind: input, shape index: {}]   ;;  %s2001_s7 = inlined_call_operand.vmem [shape: f32[32,128], index: 7, kind: input, shape index: {}]   ;;  %s2002_s8 = inlined_call_operand.vmem [shape: f32[32,128], index: 8, kind: input, shape index: {}]   ;;  %s2003_s9 = inlined_call_operand.vmem [shape: f32[128,32], index: 9, kind: input, shape index: {}]   ;;  %s2004_s10 = inlined_call_operand.hbm [shape: f32[2,8,32], index: 10, kind: output, shape index: {}]  }
   0x1   :  { %17 = vsyncpa [#allocation3 + $0x1], 0  ;;  %s1717_s13 = smov 0   ;;  %s1719_s14 = smov 0  }
   0x2   :  { %s1721_s15 = smov 0   ;;  %s1723_s16 = smov 0  }
   0x3 LB: > { %s1738_s17 = sadd.s32 4294967295, %s1650_s16   ;;  %s1301_s18 = sadd.s32 4294967294, %s1650_s16   ;;  %s1650_s16 = sphi %s1723_s16, %s2010_s16   ;;  %s1646_s15 = sphi %s1721_s15, %s2009_s15   ;;  %s1642_s14 = sphi %s1719_s14, %s2008_s14   ;;  %s1638_s13 = sphi %s1717_s13, %s2007_s13  }
   0x4   : > { %s1742_s19 = sadd.s32 1, %s1650_s16   ;;  %s245_s20 = sadd.s32 1, %s1646_s15 }
   0x5   : > { %s242_s21 = ssub.s32 %s1650_s16, %s1742_s19  ;;  %p255_p0 = scmp.ne.s32.totalorder %s1646_s15, %s1642_s14 }
   0x6   : > { %p243_p1 = scmp.eq.s32.totalorder %s242_s21, 0  ;;  %p256_p2 = scmp.eq.s32.totalorder %s1738_s17, 1 }
   0x7   : > { %p261_p3 = scmp.ne.s32.totalorder %s1642_s14, %s1638_s13  ;;  %p262_p4 = scmp.eq.s32.totalorder %s1301_s18, 1 }
   0x8   : > { %s1753_s22 = scalar_select %p243_p1, %s1646_s15, %s245_s20  }
   0x9   : > { %p1755_p5 = por %p256_p2, %p255_p0  ;;  %p1759_p6 = por %p262_p4, %p261_p3 }
   0xa   : > { %p1304_p7 = scmp.ge.s32.totalorder %s1650_s16, 1  ;;  %p314_p8 = scmp.lt.s32.totalorder %s1650_s16, 3 }
   0xc   : > { %p315_p9 = pnand %p1304_p7, %p314_p8 }
   0xd   : > { %p351_p10 = scmp.lt.s32.totalorder (!%p315_p9), %s1738_s17, 1  ;;  %vm356_vm0 = vcmask (!%p315_p9), 261120   ;;  %v387_v7 = vld [vmem:[%s1997_s3] sm:$0xff] (!%p315_p9)  ;;  %v388_v8 = vld [vmem:[%s1997_s3 + $0x8] sm:$0xff] (!%p315_p9)  ;;  %v389_v9 = vld [vmem:[%s1997_s3 + $0x10] sm:$0xff] (!%p315_p9)  ;;  %v1652_v10 = vmov (!%p315_p9), 0.0|0.0   ;;  %v464_v29 = vlaneseq (!%p315_p9) }
   0xe   : > { %318 = sbr.rel (%p315_p9) target bundleno = 2414 (0x96e), region = 60  ;;  %1476 = vmatprep.subr.bf16.mxu1 (!%p315_p9), %v1652_v10  ;;  %v1477_v11 = vpack.c.bf16 (!%p315_p9), %v388_v8, %v387_v7  ;;  %v390_v12 = vld [vmem:[%s1997_s3 + $0x18] sm:$0xff] (!%p315_p9)  ;;  %vm1653_vm1 = vmmov (!%p315_p9), 0   ;;  %v1654_v13 = vmov (!%p315_p9), 0.0   ;;  %v1307_v19 = vld [vmem:[%s1995_s1] ss:$0 sm:$0xff] (!%p315_p9) }
   0xf   : > { %1382 = vmatprep.mubr.msk.f32.mxu1 (!%p315_p9), %vm1653_vm1, %v1654_v13  ;;  %1395 = vmatprep.subr.mxu0 (!%p315_p9), %v1654_v13  ;;  %v1480_v14 = vpack.c.bf16 (!%p315_p9), %v390_v12, %v389_v9  ;;  %v1308_v21 = vld [vmem:[%s1996_s2] ss:$0 sm:$0xff] (!%p315_p9)  ;;  %s1655_s11 = smov (!%p315_p9), 112   ;;  %s1656_s12 = smov (!%p315_p9), 96   ;;  %vm473_vm2 = vcmask (!%p315_p9), 130048   ;;  %v465_v30 = vshrl.u32 (!%p315_p9), %v464_v29, 7 }
  0x10   : > { %1397 = vmatprep.mubr.msk.f32.mxu0 (!%p315_p9), %vm1653_vm1, %v1654_v13  ;;  %1478 = vmatpush3.bf16.msra.mxu1 (!%p315_p9), %v1477_v11  ;;  %s1657_s18 = smov (!%p315_p9), 80   ;;  %v467_v31 = vand.u32 (!%p315_p9), 127, %v464_v29  ;;  %v1658_v32 = vmov (!%p315_p9), -1e+30   ;;  %vm548_vm4 = vcmask (!%p315_p9), 64512   ;;  %s1659_s20 = smov (!%p315_p9), 48  }
  0x11   : > { %1479 = vmatprep.subr.bf16.mxu1 (!%p315_p9), %v1652_v10  ;;  %s1660_s21 = smov (!%p315_p9), 64   ;;  %v636_v57 = vld [vmem:[%s1998_s4] sm:$0xff] (!%p315_p9)  ;;  %v637_v58 = vld [vmem:[%s1998_s4 + $0x8] sm:$0xff] (!%p315_p9)  ;;  %v1316_v63 = vld [vmem:[%s1998_s4 + $0x10] sm:$0xff] (!%p315_p9)  ;;  %s348_s30 = sand.u32 (!%p315_p9), 1, %s1642_s14  }
  0x12   : > { %vm468_vm3 = vcmp.le.s32.totalorder (!%p315_p9), %v467_v31, %v465_v30  ;;  %v1486_v61 = vpack.c.bf16 (!%p315_p9), %v637_v58, %v636_v57  ;;  %v1320_v30 = vld [vmem:[%s1999_s5] ss:$0 sm:$0xff] (!%p315_p9)  ;;  %s1229_s27 = scalar_lea.sflag (!%p315_p9), [#allocation3], %s348_s30  ;;  %s1661_s28 = smov (!%p315_p9), [#allocation2]  }
  0x13   : > { %v469_v33 = vsel (!%p315_p9), %vm468_vm3, 0.0, %v1658_v32  ;;  %v1059_v32 = vld [vmem:[%s2002_s8] sm:$0xff] (!%p315_p9) }
  0x14   : > { %1481 = vmatpush3.bf16.msra.mxu1 (!%p315_p9), %v1480_v14  ;;  %v1152_v58 = vld [vmem:[%s2003_s9 + $0x60] sm:$0xff] (!%p315_p9) }
  0x15   : > { %s352_s25 = scalar_select %p351_p10, %s1738_s17, 1  ;;  %1385 = vmatprep.subr.mxu1 %v1654_v13 }
  0x17   : > { %s1306_s26 = sshll.u32 %s352_s25, 3 }
  0x18   : > { %s354_s29 = scalar_lea.vmem %s1994_s0, %s1306_s26 }
  0x19   : > { %v355_v0 = vld [vmem:[%s354_s29] sm:$0xff]  ;;  %s1592_s29 = sshll.u32 %s1661_s28, 4  ;;  %s1593_s29 = int_to_ptr.vmem [resolvable:$false] %s1592_s29 }
  0x1a   : > { %v357_v1 = vsel %vm356_vm0, %v355_v0, 0.0 }
  0x1b   : > { %358 = vadd.xlane.f32.xlu0 %v357_v1 }
  0xa8   : > { %v359_v2 = vpop.xlane.xlu0 %358 }
  0xa9   : > { %v361_v3 = vmul.f32 0.03125, %v359_v2 }
  0xab   : > { %v362_v4 = vsub.f32 %v355_v0, %v361_v3  ;;  %v1317_v0 = vld [vmem:[%s1998_s4 + $0x18] sm:$0xff] }
  0xac   : > { %v1483_v1 = vpack.c.bf16 %v1317_v0, %v1316_v63 }
  0xad   : > { %v363_v5 = vmul.f32 %v362_v4, %v362_v4 }
  0xaf   : > { %v364_v6 = vsel %vm356_vm0, %v363_v5, 0.0 }
  0xb0   : > { %365 = vadd.xlane.f32.xlu0 %v364_v6 }
 0x13d   : > { %v366_v15 = vpop.xlane.xlu0 %365 }
 0x13e   : > { %v367_v16 = vmul.f32 0.03125, %v366_v15 }
 0x140   : > { %v368_v17 = vadd.f32 1e-05, %v367_v16 }
 0x142   : > { %1572 = vrsqrt.f32 %v368_v17 }
 0x14c   : > { %v1573_v18 = vpop.eup %1572 }
 0x14d   : > { %v370_v20 = vmul.f32 %v1573_v18, %v362_v4 }
 0x14f   : > { %v378_v22 = vmul.f32 %v1307_v19, %v370_v20  ;;  %v982_v20 = vld [vmem:[%s2001_s7] sm:$0xff] }
 0x151   : > { %v1798_v23 = vadd.f32 %v1308_v21, %v378_v22  ;;  %v983_v21 = vld [vmem:[%s2001_s7 + $0x8] sm:$0xff] }
 0x152   : > { %v1489_v22 = vpack.c.bf16 %v983_v21, %v982_v20 }
 0x153   : > { %1383 = vmatmul.mubr.msk.f32.vlgmr.msra.gmra.mrb[0].mxu1 %vm356_vm0, %v1798_v23 }
 0x154   : > { %1387 = vmatprep.mubr.msk.f32.mxu1 %vm1653_vm1, %v1654_v13 }
 0x226   : > { %v460_v24 = vpop.f32.mrb[0].mxu1 }
 0x227   : > { %638 = vrot.lane.b32.xlu0 %v460_v24, %s1655_s11  ;;  %471 = vrot.lane.b32.xlu1 %v460_v24, %s1656_s12  ;;  %v1384_v25 = vpop.f32.mrb[1].mxu1  ;;  %s1305_s11 = sshll.u32 %s348_s30, 3  ;;  %s1325_s12 = sshll.u32 %s1738_s17, 7 }
 0x228   : > { %s1951_s26 = scalar_lea.hbm %s2004_s10, %s1325_s12 }
 0x22b   : > { %640 = vrot.lane.b32.xlu1 %v460_v24, %s1657_s18  ;;  %s350_s18 = scalar_lea.vmem [#allocation2], %s1305_s11  ;;  %s1594_s11 = scalar_lea.vmem %s1593_s29, 256 }
 0x299   : > { %v472_v26 = vpop.permute.xlu1 %471  ;;  %v639_v28 = vpop.permute.xlu0 %638 }
 0x29a   : > { %1386 = vmatpush3.xpose.msk.msra.mxu1 %vm473_vm2, %v472_v26 }
 0x29b   : > { %1390 = vmatprep.subr.mxu1 %v1654_v13 }
 0x29d   : > { %1388 = vmatmul.mubr.msk.f32.vlgmr.msra.gmra.mrb[2].mxu1 %vm473_vm2, %v460_v24  ;;  %v641_v27 = vpop.permute.xlu1 %640 }
 0x29e   : > { %1396 = vmatpush3.xpose.msk.msra.mxu0 %vm473_vm2, %v641_v27  ;;  %1392 = vmatprep.mubr.msk.f32.mxu1 %vm1653_vm1, %v1654_v13 }
 0x29f   : > { %1482 = vmatprep.subr.bf16.mxu0 %v1652_v10 }
 0x2a1   : > { %1398 = vmatmul.mubr.msk.f32.vlgmr.msra.gmra.mrb[0].mxu0 %vm473_vm2, %v639_v28 }
 0x2a2   : > { %1409 = vmatprep.mubr.msk.f32.mxu0 %vm1653_vm1, %v1654_v13  ;;  %1484 = vmatpush3.bf16.msra.mxu0 %v1483_v1 }
 0x2a3   : > { %1500 = vmatprep.subr.bf16.mxu0 %v1652_v10 }
 0x370   : > { %v544_v34 = vpop.f32.mrb[2].mxu1 }
 0x371   : > { %v545_v35 = vadd.f32 %v544_v34, %v469_v33  ;;  %v1389_v36 = vpop.f32.mrb[3].mxu1  ;;  %v1321_v34 = vld [vmem:[%s2000_s6] ss:$0 sm:$0xff] }
 0x373   : > { %v549_v37 = vsel %vm548_vm4, %v545_v35, -inf }
 0x374   : > { %v712_v38 = vpop.f32.mrb[0].mxu0  ;;  %550 = vmax.xlane.f32.xlu1 %v549_v37 }
 0x375   : > { %v713_v39 = vadd.f32 %v712_v38, %v469_v33  ;;  %v1399_v40 = vpop.f32.mrb[1].mxu0  ;;  %v1060_v33 = vld [vmem:[%s2002_s8 + $0x8] sm:$0xff]  ;;  %v1061_v38 = vld [vmem:[%s2002_s8 + $0x10] sm:$0xff] }
 0x376   : > { %v1495_v36 = vpack.c.bf16 %v1060_v33, %v1059_v32 }
 0x377   : > { %v716_v41 = vsel %vm548_vm4, %v713_v39, -inf }
 0x378   : > { %717 = vmax.xlane.f32.xlu0 %v716_v41  ;;  %v1140_v41 = vld [vmem:[%s2003_s9] sm:$0xff] }
 0x38e   : > { %727 = vrot.lane.b32.xlu0 %v460_v24, %s1659_s20  ;;  %s1242_s20 = sshll.u32 %s350_s18, 4  ;;  %s1953_s20 = int_to_ptr.vmem [resolvable:$true] %s1242_s20 }
 0x38f   : > { %s1588_s17 = scalar_lea.vmem %s1953_s20, 128  ;;  %p1595_p0 = scmp.lt.s32.totalorder %s1953_s20, %s1593_s29 }
 0x390   : > { %p1589_p11 = scmp.ne.s32.totalorder %s1953_s20, %s1588_s17  ;;  %p1596_p1 = scmp.lt.s32.totalorder %s1594_s11, %s1588_s17 }
 0x392   : > { %p1590_p12 = pnand %p1589_p11, %p1755_p5  ;;  %p1597_p2 = por %p1596_p1, %p1595_p0 }
 0x394   : > { %p1591_p13 = pneg %p1590_p12 }
 0x396   : > { %p1598_p3 = pnand %p1597_p2, %p1591_p13 }
 0x401   : > { %v551_v42 = vpop.xlane.xlu1 %550 }
 0x402   : > { %v552_v43 = vsub.f32 %v545_v35, %v551_v42  ;;  %v1141_v42 = vld [vmem:[%s2003_s9 + $0x8] sm:$0xff] }
 0x404   : > { %v553_v44 = vmul.f32 1.442695, %v552_v43  ;;  %v1501_v43 = vpack.c.bf16 %v1141_v42, %v1140_v41 }
 0x405   : > { %v718_v45 = vpop.xlane.xlu0 %717 }
 0x406   : > { %1574 = vpow2.f32 %v553_v44  ;;  %v719_v46 = vsub.f32 %v713_v39, %v718_v45  ;;  %v1062_v39 = vld [vmem:[%s2002_s8 + $0x18] sm:$0xff] }
 0x407   : > { %v1498_v40 = vpack.c.bf16 %v1062_v39, %v1061_v38  ;;  %v1143_v44 = vld [vmem:[%s2003_s9 + $0x18] sm:$0xff] }
 0x408   : > { %v720_v47 = vmul.f32 1.442695, %v719_v46  ;;  %v1144_v46 = vld [vmem:[%s2003_s9 + $0x20] sm:$0xff] }
 0x409   : > { %v728_v59 = vpop.permute.xlu0 %727 }
 0x40a   : > { %1576 = vpow2.f32 %v720_v47  ;;  %v1145_v47 = vld [vmem:[%s2003_s9 + $0x28] sm:$0xff] }
 0x410   : > { %v1575_v48 = vpop.eup %1574 }
 0x411   : > { %v555_v49 = vsel %vm548_vm4, %v1575_v48, 0.0 }
 0x412   : > { %556 = vadd.xlane.f32.xlu1 %v555_v49  ;;  %v1146_v49 = vld [vmem:[%s2003_s9 + $0x30] sm:$0xff] }
 0x414   : > { %v1577_v50 = vpop.eup %1576 }
 0x415   : > { %v722_v51 = vsel %vm548_vm4, %v1577_v50, 0.0 }
 0x416   : > { %723 = vadd.xlane.f32.xlu1 %v722_v51 }
 0x427   : > { %560 = vrot.lane.b32.xlu1 %v460_v24, %s1660_s21  ;;  %v985_v24 = vld [vmem:[%s2001_s7 + $0x18] sm:$0xff] }
 0x49f   : > { %v557_v52 = vpop.xlane.xlu1 %556 }
 0x4a0   : > { %1578 = vrcp.f32 %v557_v52  ;;  %v1148_v52 = vld [vmem:[%s2003_s9 + $0x40] sm:$0xff] }
 0x4a3   : > { %v724_v53 = vpop.xlane.xlu1 %723 }
 0x4a4   : > { %1580 = vrcp.f32 %v724_v53  ;;  %v1149_v53 = vld [vmem:[%s2003_s9 + $0x48] sm:$0xff] }
 0x4a7   : > { %v561_v54 = vpop.permute.xlu1 %560 }
 0x4a8   : > { %1391 = vmatpush3.msra.mxu1 %v561_v54  ;;  %v1513_v54 = vpack.c.bf16 %v1149_v53, %v1148_v52 }
 0x4a9   : > { %1400 = vmatprep.subr.mxu1 %v1654_v13 }
 0x4aa   : > { %v1579_v55 = vpop.eup %1578 }
 0x4ab   : > { %v559_v56 = vmul.f32 %v1579_v55, %v1575_v48  ;;  %v1507_v48 = vpack.c.bf16 %v1145_v47, %v1144_v46  ;;  %v1150_v55 = vld [vmem:[%s2003_s9 + $0x50] sm:$0xff] }
 0x4ad   : > { %1393 = vmatmul.mubr.msk.f32.vlgmr.msra.gmra.mrb[4].mxu1 %vm548_vm4, %v559_v56  ;;  %v1151_v56 = vld [vmem:[%s2003_s9 + $0x58] sm:$0xff] }
 0x4ae   : > { %v1581_v60 = vpop.eup %1580  ;;  %1401 = vmatpush3.msra.mxu1 %v728_v59  ;;  %1402 = vmatprep.mubr.msk.f32.mxu1 %vm1653_vm1, %v1654_v13  ;;  %v1516_v57 = vpack.c.bf16 %v1151_v56, %v1150_v55  ;;  %v1153_v59 = vld [vmem:[%s2003_s9 + $0x68] sm:$0xff] }
 0x4af   : > { %v726_v62 = vmul.f32 %v1581_v60, %v1577_v50  ;;  %1485 = vmatprep.subr.bf16.mxu1 %v1652_v10  ;;  %v1147_v50 = vld [vmem:[%s2003_s9 + $0x38] sm:$0xff]  ;;  %v1519_v60 = vpack.c.bf16 %v1153_v59, %v1152_v58 }
 0x4b0   : > { %v1510_v51 = vpack.c.bf16 %v1147_v50, %v1146_v49 }
 0x4b1   : > { %1403 = vmatmul.mubr.msk.f32.vlgmr.msra.gmra.mrb[6].mxu1 %vm548_vm4, %v726_v62  ;;  %v1155_v62 = vld [vmem:[%s2003_s9 + $0x78] sm:$0xff] }
 0x4b2   : > { %1487 = vmatpush3.bf16.msra.mxu1 %v1486_v61  ;;  %1416 = vmatprep.mubr.msk.f32.mxu1 %vm1653_vm1, %v1654_v13  ;;  %v1154_v61 = vld [vmem:[%s2003_s9 + $0x70] sm:$0xff] }
 0x4b3   : > { %1488 = vmatprep.subr.bf16.mxu1 %v1652_v10  ;;  %v1522_v63 = vpack.c.bf16 %v1155_v62, %v1154_v61 }
 0x580   : > { %v632_v2 = vpop.f32.mrb[4].mxu1 }
 0x581   : > { %v1394_v3 = vpop.f32.mrb[5].mxu1  ;;  %1417 = vmatmul.mubr.msk.f32.vlgmr.msra.gmra.mrb[8].mxu1 %vm473_vm2, %v632_v2 }
 0x582   : > { %1427 = vmatprep.mubr.msk.f32.mxu1 %vm1653_vm1, %v1654_v13  ;;  %1490 = vmatpush3.bf16.msra.mxu1 %v1489_v22 }
 0x583   : > { %1491 = vmatprep.subr.bf16.mxu1 %v1652_v10 }
 0x584   : > { %v799_v4 = vpop.f32.mrb[6].mxu1 }
 0x585   : > { %v1404_v5 = vpop.f32.mrb[7].mxu1  ;;  %1410 = vmatmul.mubr.msk.f32.vlgmr.msra.gmra.mrb[2].mxu0 %vm473_vm2, %v799_v4 }
 0x586   : > { %1473 = vmatprep.mubr.msk.f32.mxu0 %vm1653_vm1, %v1654_v13  ;;  %1502 = vmatpush3.bf16.msra.mxu0 %v1501_v43 }
 0x587   : > { %1503 = vmatprep.subr.bf16.mxu0 %v1652_v10 }
 0x654   : > { %v948_v6 = vpop.f32.mrb[8].mxu1 }
 0x655   : > { %v1418_v7 = vpop.f32.mrb[9].mxu1 }
 0x658   : > { %v875_v8 = vpop.f32.mrb[2].mxu0 }
 0x659   : > { %v949_v9 = vadd.f32 %v948_v6, %v875_v8  ;;  %v1411_v11 = vpop.f32.mrb[3].mxu0 }
 0x65b   : > { %v952_v12 = vadd.f32 %v949_v9, %v1798_v23  ;;  %v984_v23 = vld [vmem:[%s2001_s7 + $0x10] sm:$0xff] }
 0x65c   : > { %v1492_v25 = vpack.c.bf16 %v985_v24, %v984_v23 }
 0x65d   : > { %v953_v14 = vsel %vm356_vm0, %v952_v12, 0.0 }
 0x65e   : > { %954 = vadd.xlane.f32.xlu1 %v953_v14  ;;  %1493 = vmatpush3.bf16.msra.mxu1 %v1492_v25 }
 0x65f   : > { %1494 = vmatprep.subr.bf16.mxu1 %v1652_v10 }
 0x6eb   : > { %v955_v15 = vpop.xlane.xlu1 %954 }
 0x6ec   : > { %v956_v16 = vmul.f32 0.03125, %v955_v15 }
 0x6ee   : > { %v957_v17 = vsub.f32 %v952_v12, %v956_v16 }
 0x6f0   : > { %v958_v18 = vmul.f32 %v957_v17, %v957_v17 }
 0x6f2   : > { %v959_v19 = vsel %vm356_vm0, %v958_v18, 0.0 }
 0x6f3   : > { %960 = vadd.xlane.f32.xlu0 %v959_v19 }
 0x780   : > { %v961_v26 = vpop.xlane.xlu0 %960 }
 0x781   : > { %v962_v27 = vmul.f32 0.03125, %v961_v26 }
 0x783   : > { %v963_v28 = vadd.f32 1e-05, %v962_v27 }
 0x785   : > { %1582 = vrsqrt.f32 %v963_v28 }
 0x78f   : > { %v1583_v29 = vpop.eup %1582 }
 0x790   : > { %v965_v31 = vmul.f32 %v1583_v29, %v957_v17 }
 0x792   : > { %v973_v35 = vmul.f32 %v1320_v30, %v965_v31 }
 0x794   : > { %v1875_v37 = vadd.f32 %v1321_v34, %v973_v35 }
 0x796   : > { %1428 = vmatmul.mubr.msk.f32.vlgmr.msra.gmra.mrb[10].mxu1 %vm356_vm0, %v1875_v37 }
 0x797   : > { %1496 = vmatpush3.bf16.msra.mxu1 %v1495_v36  ;;  %1438 = vmatprep.mubr.msk.f32.mxu1 %vm1653_vm1, %v1654_v13  ;;  %v1142_v13 = vld [vmem:[%s2003_s9 + $0x10] sm:$0xff] }
 0x798   : > { %1497 = vmatprep.subr.bf16.mxu1 %v1652_v10  ;;  %v1504_v45 = vpack.c.bf16 %v1143_v44, %v1142_v13 }
 0x79a   : > { %1505 = vmatpush3.bf16.msra.mxu0 %v1504_v45 }
 0x79b   : > { %1499 = vmatpush3.bf16.msra.mxu1 %v1498_v40  ;;  %1506 = vmatprep.subr.bf16.mxu0 %v1652_v10 }
 0x79e   : > { %1439 = vmatmul.mubr.msk.f32.vlgmr.msra.gmra.mrb[12].mxu1 %vm356_vm0, %v1875_v37  ;;  %1508 = vmatpush3.bf16.msra.mxu0 %v1507_v48 }
 0x79f   : > { %1509 = vmatprep.subr.bf16.mxu0 %v1652_v10 }
 0x7a2   : > { %1511 = vmatpush3.bf16.msra.mxu0 %v1510_v51 }
 0x7a3   : > { %1512 = vmatprep.subr.bf16.mxu0 %v1652_v10 }
 0x7a6   : > { %1514 = vmatpush3.bf16.msra.mxu0 %v1513_v54 }
 0x7a7   : > { %1515 = vmatprep.subr.bf16.mxu0 %v1652_v10 }
 0x7aa   : > { %1517 = vmatpush3.bf16.msra.mxu0 %v1516_v57 }
 0x7ab   : > { %1518 = vmatprep.subr.bf16.mxu0 %v1652_v10 }
 0x7ae   : > { %1520 = vmatpush3.bf16.msra.mxu0 %v1519_v60 }
 0x7af   : > { %1521 = vmatprep.subr.bf16.mxu0 %v1652_v10 }
 0x7b2   : > { %1523 = vmatpush3.bf16.msra.mxu0 %v1522_v63 }
 0x869   : > { %v1055_v0 = vpop.f32.mrb[10].mxu1 }
 0x86a   : > { %v1133_v1 = vsub.f32 0.0, %v1055_v0  ;;  %v1429_v2 = vpop.f32.mrb[11].mxu1 }
 0x86c   : > { %v1134_v3 = vmul.f32 1.442695, %v1133_v1 }
 0x86e   : > { %1584 = vpow2.f32 %v1134_v3 }
 0x871   : > { %v1129_v4 = vpop.f32.mrb[12].mxu1 }
 0x872   : > { %v1440_v5 = vpop.f32.mrb[13].mxu1 }
 0x878   : > { %v1585_v10 = vpop.eup %1584 }
 0x879   : > { %v1136_v6 = vadd.f32 1.0, %v1585_v10 }
 0x87b   : > { %1586 = vrcp.f32 %v1136_v6 }
 0x885   : > { %v1587_v7 = vpop.eup %1586 }
 0x886   : > { %v1138_v8 = vmul.f32 %v1587_v7, %v1055_v0 }
 0x888   : > { %v1139_v9 = vmul.f32 %v1138_v8, %v1129_v4 }
 0x88a   : > { %1474 = vmatmul.mubr.f32.vlgmr.msra.gmra.mrb[4].mxu0 %v1139_v9 }
 0x95d   : > { %v1222_v11 = vpop.f32.mrb[4].mxu0 }
 0x95e   : > { %v1226_v12 = vadd.f32 %v1222_v11, %v1875_v37  ;;  %v1475_v14 = vpop.f32.mrb[5].mxu0 }
 0x960   : > { %1227 = vst.msk [vmem:[%s350_s18] sm:$0xff] %vm356_vm0, %v1226_v12 }
 0x961   : > { %1601 = shalt.err (!%p1598_p3)
}
 0x962   : > { %s1602_s30 = scalar_lea.hbm %s1951_s26, 128  ;;  %s1606_s21 = scalar_lea.hbm %s2004_s10, 256 }
 0x963   : > { %p1603_p4 = scmp.ne.s32.totalorder %s1951_s26, %s1602_s30  ;;  %p1607_p9 = scmp.lt.u32.totalorder %s1951_s26, %s2004_s10 }
 0x964   : > { %p1608_p10 = scmp.lt.u32.totalorder %s1606_s21, %s1602_s30  ;;  %p1610_p12 = scmp.lt.u32.totalorder %s1602_s30, %s1951_s26 }
 0x965   : > { %p1604_p7 = pnand %p1603_p4, %p1755_p5 }
 0x966   : > { %p1609_p11 = por %p1608_p10, %p1607_p9 }
 0x967   : > { %p1605_p8 = pneg %p1604_p7 }
 0x968   : > { %p1611_p13 = por %p1610_p12, %p1609_p11 }
 0x96a   : > { %p1612_p0 = pnand %p1611_p13, %p1605_p8 }
 0x96c   : > { %1615 = shalt.err (!%p1612_p0)
}
 0x96d   : > { %1524 = dma.vmem_to_hbm [thread:$0]  (%p1755_p5), %s1953_s20, 128, %s1951_s26, %s1229_s27  }
 0x96e PF: > { %p1530_p1 = scmp.ge.s32.totalorder %s1650_s16, 2  ;;  %s1254_s17 = sand.u32 1, %s1638_s13  }
 0x96f   : > { %s1255_s29 = scalar_lea.sflag [#allocation3], %s1254_s17 }
 0x970   : > { %p1527_p2 = pnand %p1530_p1, %p1759_p6 }
 0x972   : > { %1633 = dma.done.wait (!%p1527_p2), %s1255_s29, 128  }
 0x973   : > { %1635 = vsyncadd (!%p1527_p2), %s1255_s29, 4294967168  ;;  %p20_p3 = scmp.ge.s32.totalorder %s1742_s19, 4   ;;  %s2007_s13 = smov %s1642_s14 }
 0x974   : > { %s2008_s14 = smov %s1646_s15  ;;  %s2009_s15 = smov %s1753_s22 }
 0x975   : > { %s2010_s16 = smov %s1742_s19  ;;  %22 = sbr.rel (!%p20_p3) target bundleno = 3 (0x3), region = 96 }
 0x97c   :  { %1260 = vsyncpa [#allocation3], 1 }
 0x97d   :  { %1262 = vsyncpa [#allocation3 + $0x1], 1 }

</bundles_post_ra>
